<compile_context>
chip_gen: v7x
topology: tpu7x:2x2x1
jax: 0.10.0
libtpu: 0.0.40
codegen_flags: <defaults>
</compile_context>

<pallas_src>
import jax
import jax.numpy as jnp
from jax.experimental import pallas as pl
from jax.experimental.pallas import tpu as pltpu

# Full-precision f32 matmuls everywhere (wrapper weight folds, reference and
# in-kernel dots).  Without this the TPU default truncates f32 matmul operands
# to bf16 and the differently-factorized kernel/reference diverge > 2e-3.
jax.config.update("jax_default_matmul_precision", "highest")

# ---- config (small, consistent with the module's forward) -------------------
B, S, H = 2, 8, 32          # batch, seq_len, hidden_size
R = B * S                   # batch folded into rows
NUM_HEADS = 4
HEAD_DIM = H // NUM_HEADS
INTER = 64                  # intermediate_size
EPS = 1e-6                  # rms_norm_eps
ROPE_THETA = 10000.0
PACK_W = 4 * H + NUM_HEADS * H   # [q | k | q_rot | k_rot | vo_0..vo_3] = 256


def decoder_layer_kernel(x_ref, const_ref, wpack_ref, wgu_ref, wd_ref, o_ref):
    x = x_ref[...]                          # (R, H)
    consts = const_ref[...]                 # (3R, H): [cos | sin | mask(pad)]
    cos_t = consts[0:R]                     # (R, H)   sublane slices, 8-aligned
    sin_t = consts[R:2 * R]                 # (R, H)
    mask = consts[2 * R:3 * R, 0:R]         # (R, R) additive causal+batch mask

    # ---- input RMSNorm (gamma folded into w_pack wrapper-side) ----
    xn = x * jax.lax.rsqrt(jnp.mean(x * x, axis=-1, keepdims=True) + EPS)

    # ---- single packed, lane-dense projection (one MXU push) ----
    # columns: [Wq*scale | Wk | (Wq@P)*scale | Wk@P | per-head Wv_h@Wo_h]
    proj = jnp.dot(xn, wpack_ref[...], preferred_element_type=jnp.float32)
    q = proj[:, 0 * H:1 * H]                # already scaled by 1/sqrt(HEAD_DIM)
    k = proj[:, 1 * H:2 * H]
    qr = proj[:, 2 * H:3 * H]               # rotate_half(q)*scale (via Wq @ P)
    kr = proj[:, 3 * H:4 * H]               # rotate_half(k)        (via Wk @ P)
    vo = proj[:, 4 * H:]                    # (R, NH*H): per-head xn @ Wv_h @ Wo_h

    # ---- RoPE on the full (R, H) q and k in one shot (pure VPU) ----
    q_rope = q * cos_t + qr * sin_t
    k_rope = k * cos_t + kr * sin_t

    # ---- per-head scores (MXU NT matmuls), masked, sublane-stacked ----
    s_parts = []
    for h in range(NUM_HEADS):
        sl = slice(h * HEAD_DIM, (h + 1) * HEAD_DIM)
        s = jax.lax.dot_general(q_rope[:, sl], k_rope[:, sl],
                                (((1,), (1,)), ((), ())),
                                preferred_element_type=jnp.float32)   # (R, R)
        s_parts.append(s + mask)
    s_all = jnp.concatenate(s_parts, axis=0)      # (NH*R, R): vreg stacking

    # ---- ONE fused softmax for all heads ----
    s_all = s_all - jnp.max(s_all, axis=-1, keepdims=True)
    p_all = jnp.exp(s_all)
    # exact reciprocal: approx=True adds ~1e-3-level error for ~zero gain here
    p_all = p_all * pl.reciprocal(jnp.sum(p_all, axis=-1, keepdims=True),
                                  approx=False)

    # ---- per-head p @ (xn @ Wv_h @ Wo_h), statically unrolled ----
    attn = jnp.zeros((R, H), jnp.float32)
    for h in range(NUM_HEADS):
        attn = attn + jnp.dot(p_all[h * R:(h + 1) * R],
                              vo[:, h * H:(h + 1) * H],
                              preferred_element_type=jnp.float32)

    h1 = x + attn                           # first residual

    # ---- post-attn RMSNorm (gamma folded into w_gu) + SwiGLU MLP ----
    hn = h1 * jax.lax.rsqrt(jnp.mean(h1 * h1, axis=-1, keepdims=True) + EPS)
    gu = jnp.dot(hn, wgu_ref[...], preferred_element_type=jnp.float32)
    gate = gu[:, :INTER]
    up = gu[:, INTER:]
    mlp = jnp.dot(gate * jax.nn.sigmoid(gate) * up, wd_ref[...],
                  preferred_element_type=jnp.float32)

    o_ref[...] = h1 + mlp                   # second residual


def _full_spec(shape):
    return pl.BlockSpec(shape, lambda i: (0,) * len(shape))


def _rotate_half_matrix():
    """(H, H) block-diagonal matrix M with x @ M == per-head rotate_half(x)."""
    half = HEAD_DIM // 2
    cols = jnp.arange(H)
    c_local = cols % HEAD_DIM
    src = jnp.where(c_local < half, cols + half, cols - half)
    sign = jnp.where(c_local < half, -1.0, 1.0).astype(jnp.float32)
    return jnp.zeros((H, H), jnp.float32).at[src, cols].set(sign)


@jax.jit
def llama_decoder_layer(x, cos, sin, wq, wk, wv, wo, wg, wu, wd, ln1, ln2):
    scale = 1.0 / (HEAD_DIM ** 0.5)
    P = _rotate_half_matrix()

    # per-head V@Wo fold: Wvo_h = Wv[:, h] @ Wo[h, :]   -> packed (H, NH*H)
    # (small-H trick only: O(NH*H^2) weight bytes; don't carry to real dims)
    wvo = jnp.concatenate(
        [wv[:, h * HEAD_DIM:(h + 1) * HEAD_DIM]
         @ wo[h * HEAD_DIM:(h + 1) * HEAD_DIM, :] for h in range(NUM_HEADS)],
        axis=1)
    # packed projection (32, 256) with the input-RMSNorm gamma folded in
    w_pack = ln1.reshape(H, 1) * jnp.concatenate(
        [wq * scale, wk, (wq @ P) * scale, wk @ P, wvo], axis=1)
    # packed gate|up (32, 128), lane-dense, post-attn gamma folded in
    w_gu = ln2.reshape(H, 1) * jnp.concatenate([wg, wu], axis=1)

    # constants slab (3R, H): cos/sin tiled across heads+batch, mask padded
    cos_t = jnp.tile(cos, (B, NUM_HEADS)).astype(jnp.float32)      # (R, H)
    sin_t = jnp.tile(sin, (B, NUM_HEADS)).astype(jnp.float32)      # (R, H)
    idx = jnp.arange(R)
    allowed = ((idx[:, None] // S) == (idx[None, :] // S)) & \
              (idx[:, None] >= idx[None, :])
    mask = jnp.where(allowed, 0.0, -1e30).astype(jnp.float32)      # (R, R)
    mask_pad = jnp.zeros((R, H), jnp.float32).at[:, :R].set(mask)
    consts = jnp.concatenate([cos_t, sin_t, mask_pad], axis=0)     # (3R, H)

    x2 = x.reshape(R, H)

    out2 = pl.pallas_call(
        decoder_layer_kernel,
        out_shape=jax.ShapeDtypeStruct((R, H), jnp.float32),
        grid=(1,),
        in_specs=[
            _full_spec((R, H)),                 # hidden_states (batch folded)
            _full_spec((3 * R, H)),             # cos | sin | mask slab
            _full_spec((H, PACK_W)),            # packed qkv/rope/vo weights
            _full_spec((H, 2 * INTER)),         # packed gate|up
            _full_spec((INTER, H)),             # W_down
        ],
        out_specs=_full_spec((R, H)),
        compiler_params=pltpu.CompilerParams(
            dimension_semantics=("arbitrary",)),
    )(x2, consts, w_pack, w_gu, wd)

    return out2.reshape(B, S, H)


def reference(x, cos, sin, wq, wk, wv, wo, wg, wu, wd, ln1, ln2):
    def rms(t, w):
        var = jnp.mean(t * t, axis=-1, keepdims=True)
        return t * jax.lax.rsqrt(var + EPS) * w

    def rope(t):  # (B, NH, S, D)
        c, s = cos[None, None], sin[None, None]
        half = HEAD_DIM // 2
        rot = jnp.concatenate([-t[..., half:], t[..., :half]], axis=-1)
        return t * c + rot * s

    xn = rms(x, ln1.reshape(H))
    q = (xn @ wq).reshape(B, S, NUM_HEADS, HEAD_DIM).transpose(0, 2, 1, 3)
    k = (xn @ wk).reshape(B, S, NUM_HEADS, HEAD_DIM).transpose(0, 2, 1, 3)
    v = (xn @ wv).reshape(B, S, NUM_HEADS, HEAD_DIM).transpose(0, 2, 1, 3)
    q, k = rope(q), rope(k)
    scores = jnp.einsum("bhqd,bhkd->bhqk", q, k) / (HEAD_DIM ** 0.5)
    mask = jnp.where(jnp.arange(S)[:, None] >= jnp.arange(S)[None, :], 0.0, -1e30)
    scores = scores + mask
    p = jax.nn.softmax(scores, axis=-1)
    ctx = jnp.einsum("bhqk,bhkd->bhqd", p, v).transpose(0, 2, 1, 3).reshape(B, S, H)
    h1 = x + ctx @ wo
    hn = rms(h1, ln2.reshape(H))
    return h1 + (jax.nn.silu(hn @ wg) * (hn @ wu)) @ wd


if __name__ == "__main__":
    key = jax.random.PRNGKey(0)
    keys = jax.random.split(key, 10)

    x = jax.random.normal(keys[0], (B, S, H), dtype=jnp.float32)

    def init(k, shape, fan_in):
        return (jax.random.normal(k, shape, dtype=jnp.float32) / (fan_in ** 0.5))

    wq = init(keys[1], (H, H), H)
    wk = init(keys[2], (H, H), H)
    wv = init(keys[3], (H, H), H)
    wo = init(keys[4], (H, H), H)
    wg = init(keys[5], (H, INTER), H)
    wu = init(keys[6], (H, INTER), H)
    wd = init(keys[7], (INTER, H), INTER)
    ln1 = 1.0 + 0.1 * jax.random.normal(keys[8], (1, H), dtype=jnp.float32)
    ln2 = 1.0 + 0.1 * jax.random.normal(keys[9], (1, H), dtype=jnp.float32)

    # rotary embedding tables (HF convention), shape (S, HEAD_DIM)
    inv_freq = 1.0 / (ROPE_THETA ** (jnp.arange(0, HEAD_DIM, 2, dtype=jnp.float32) / HEAD_DIM))
    freqs = jnp.outer(jnp.arange(S, dtype=jnp.float32), inv_freq)
    emb = jnp.concatenate([freqs, freqs], axis=-1)
    cos, sin = jnp.cos(emb), jnp.sin(emb)

    out = llama_decoder_layer(x, cos, sin, wq, wk, wv, wo, wg, wu, wd, ln1, ln2)
    out = jax.block_until_ready(out)

    ref = reference(x, cos, sin, wq, wk, wv, wo, wg, wu, wd, ln1, ln2)
    assert out.shape == (B, S, H) and out.dtype == jnp.float32
    # With matmul precision forced to "highest" and an exact softmax
    # reciprocal, the only remaining differences are f32 reassociation from the
    # folded weight factorizations (~1e-5 level); 2e-3 has ample headroom.
    assert jnp.allclose(out, ref, atol=2e-3, rtol=2e-3), "mismatch vs JAX reference"

    print("KERNEL_OK")
</pallas_src>

<mosaic_0001>
module attributes {stable_mosaic.version = 11 : i64} {
  func.func @decoder_layer_kernel(%arg0: i32, %arg1: memref<16x32xf32, #tpu.memory_space<vmem>>, %arg2: memref<48x32xf32, #tpu.memory_space<vmem>>, %arg3: memref<32x256xf32, #tpu.memory_space<vmem>>, %arg4: memref<32x128xf32, #tpu.memory_space<vmem>>, %arg5: memref<64x32xf32, #tpu.memory_space<vmem>>, %arg6: memref<16x32xf32, #tpu.memory_space<vmem>>) attributes {dimension_semantics = [#tpu.dimension_semantics<arbitrary>], iteration_bounds = array<i64: 1>, scalar_prefetch = 0 : i64, scratch_operands = 0 : i64, tpu.core_type = #tpu.core_type<tc>, window_params = [{pipeline_mode = #tpu.pipeline_mode<synchronous>, transform_indices = @transform_0, window_bounds = array<i64: 16, 32>}, {pipeline_mode = #tpu.pipeline_mode<synchronous>, transform_indices = @transform_1, window_bounds = array<i64: 48, 32>}, {pipeline_mode = #tpu.pipeline_mode<synchronous>, transform_indices = @transform_2, window_bounds = array<i64: 32, 256>}, {pipeline_mode = #tpu.pipeline_mode<synchronous>, transform_indices = @transform_3, window_bounds = array<i64: 32, 128>}, {pipeline_mode = #tpu.pipeline_mode<synchronous>, transform_indices = @transform_4, window_bounds = array<i64: 64, 32>}, {pipeline_mode = #tpu.pipeline_mode<synchronous>, transform_indices = @transform_5, window_bounds = array<i64: 16, 32>}]} {
    %c0 = arith.constant 0 : index
    %c0_0 = arith.constant 0 : index
    %0 = vector.load %arg1[%c0, %c0_0] : memref<16x32xf32, #tpu.memory_space<vmem>>, vector<16x32xf32>
    %c0_1 = arith.constant 0 : index
    %c0_2 = arith.constant 0 : index
    %1 = vector.load %arg2[%c0_1, %c0_2] : memref<48x32xf32, #tpu.memory_space<vmem>>, vector<48x32xf32>
    %2 = vector.extract_strided_slice %1 {offsets = [0, 0], sizes = [16, 32], strides = [1, 1]} : vector<48x32xf32> to vector<16x32xf32>
    %3 = vector.extract_strided_slice %1 {offsets = [16, 0], sizes = [16, 32], strides = [1, 1]} : vector<48x32xf32> to vector<16x32xf32>
    %4 = vector.extract_strided_slice %1 {offsets = [32, 0], sizes = [16, 16], strides = [1, 1]} : vector<48x32xf32> to vector<16x16xf32>
    %5 = arith.mulf %0, %0 : vector<16x32xf32>
    %cst = arith.constant dense<0.000000e+00> : vector<16xf32>
    %6 = vector.multi_reduction <add>, %5, %cst [1] : vector<16x32xf32> to vector<16xf32>
    %7 = vector.shape_cast %6 : vector<16xf32> to vector<16x1xf32>
    %cst_3 = arith.constant 3.200000e+01 : f32
    %8 = vector.broadcast %cst_3 : f32 to vector<16x1xf32>
    %9 = arith.divf %7, %8 : vector<16x1xf32>
    %cst_4 = arith.constant 9.99999997E-7 : f32
    %10 = vector.broadcast %cst_4 : f32 to vector<16x1xf32>
    %11 = arith.addf %9, %10 : vector<16x1xf32>
    %12 = math.rsqrt %11 : vector<16x1xf32>
    %13 = vector.broadcast %12 : vector<16x1xf32> to vector<16x32xf32>
    %14 = arith.mulf %0, %13 : vector<16x32xf32>
    %c0_5 = arith.constant 0 : index
    %c0_6 = arith.constant 0 : index
    %15 = vector.load %arg3[%c0_5, %c0_6] : memref<32x256xf32, #tpu.memory_space<vmem>>, vector<32x256xf32>
    %cst_7 = arith.constant dense<0.000000e+00> : vector<16x256xf32>
    %16 = tpu.matmul %14, %15, %cst_7 {dimension_numbers = #tpu.dot_dimension_numbers<[1], [0], [0], [1], [0, 0, 1, 1], [], []>, precision = #tpu.contract_precision<fp32>} : vector<16x32xf32>, vector<32x256xf32>, vector<16x256xf32> -> vector<16x256xf32>
    %17 = vector.extract_strided_slice %16 {offsets = [0, 0], sizes = [16, 32], strides = [1, 1]} : vector<16x256xf32> to vector<16x32xf32>
    %18 = vector.extract_strided_slice %16 {offsets = [0, 32], sizes = [16, 32], strides = [1, 1]} : vector<16x256xf32> to vector<16x32xf32>
    %19 = vector.extract_strided_slice %16 {offsets = [0, 64], sizes = [16, 32], strides = [1, 1]} : vector<16x256xf32> to vector<16x32xf32>
    %20 = vector.extract_strided_slice %16 {offsets = [0, 96], sizes = [16, 32], strides = [1, 1]} : vector<16x256xf32> to vector<16x32xf32>
    %21 = vector.extract_strided_slice %16 {offsets = [0, 128], sizes = [16, 128], strides = [1, 1]} : vector<16x256xf32> to vector<16x128xf32>
    %22 = arith.mulf %17, %2 : vector<16x32xf32>
    %23 = arith.mulf %19, %3 : vector<16x32xf32>
    %24 = arith.addf %22, %23 : vector<16x32xf32>
    %25 = arith.mulf %18, %2 : vector<16x32xf32>
    %26 = arith.mulf %20, %3 : vector<16x32xf32>
    %27 = arith.addf %25, %26 : vector<16x32xf32>
    %28 = vector.extract_strided_slice %24 {offsets = [0, 0], sizes = [16, 8], strides = [1, 1]} : vector<16x32xf32> to vector<16x8xf32>
    %29 = vector.extract_strided_slice %27 {offsets = [0, 0], sizes = [16, 8], strides = [1, 1]} : vector<16x32xf32> to vector<16x8xf32>
    %cst_8 = arith.constant dense<0.000000e+00> : vector<16x16xf32>
    %30 = tpu.matmul %28, %29, %cst_8 {dimension_numbers = #tpu.dot_dimension_numbers<[1], [1], [0], [0], [0, 0, 1, 0], [], []>, precision = #tpu.contract_precision<fp32>} : vector<16x8xf32>, vector<16x8xf32>, vector<16x16xf32> -> vector<16x16xf32>
    %31 = arith.addf %30, %4 : vector<16x16xf32>
    %32 = vector.extract_strided_slice %24 {offsets = [0, 8], sizes = [16, 8], strides = [1, 1]} : vector<16x32xf32> to vector<16x8xf32>
    %33 = vector.extract_strided_slice %27 {offsets = [0, 8], sizes = [16, 8], strides = [1, 1]} : vector<16x32xf32> to vector<16x8xf32>
    %cst_9 = arith.constant dense<0.000000e+00> : vector<16x16xf32>
    %34 = tpu.matmul %32, %33, %cst_9 {dimension_numbers = #tpu.dot_dimension_numbers<[1], [1], [0], [0], [0, 0, 1, 0], [], []>, precision = #tpu.contract_precision<fp32>} : vector<16x8xf32>, vector<16x8xf32>, vector<16x16xf32> -> vector<16x16xf32>
    %35 = arith.addf %34, %4 : vector<16x16xf32>
    %36 = vector.extract_strided_slice %24 {offsets = [0, 16], sizes = [16, 8], strides = [1, 1]} : vector<16x32xf32> to vector<16x8xf32>
    %37 = vector.extract_strided_slice %27 {offsets = [0, 16], sizes = [16, 8], strides = [1, 1]} : vector<16x32xf32> to vector<16x8xf32>
    %cst_10 = arith.constant dense<0.000000e+00> : vector<16x16xf32>
    %38 = tpu.matmul %36, %37, %cst_10 {dimension_numbers = #tpu.dot_dimension_numbers<[1], [1], [0], [0], [0, 0, 1, 0], [], []>, precision = #tpu.contract_precision<fp32>} : vector<16x8xf32>, vector<16x8xf32>, vector<16x16xf32> -> vector<16x16xf32>
    %39 = arith.addf %38, %4 : vector<16x16xf32>
    %40 = vector.extract_strided_slice %24 {offsets = [0, 24], sizes = [16, 8], strides = [1, 1]} : vector<16x32xf32> to vector<16x8xf32>
    %41 = vector.extract_strided_slice %27 {offsets = [0, 24], sizes = [16, 8], strides = [1, 1]} : vector<16x32xf32> to vector<16x8xf32>
    %cst_11 = arith.constant dense<0.000000e+00> : vector<16x16xf32>
    %42 = tpu.matmul %40, %41, %cst_11 {dimension_numbers = #tpu.dot_dimension_numbers<[1], [1], [0], [0], [0, 0, 1, 0], [], []>, precision = #tpu.contract_precision<fp32>} : vector<16x8xf32>, vector<16x8xf32>, vector<16x16xf32> -> vector<16x16xf32>
    %43 = arith.addf %42, %4 : vector<16x16xf32>
    %44 = tpu.concatenate %31, %35, %39, %43 in 0 : vector<16x16xf32>, vector<16x16xf32>, vector<16x16xf32>, vector<16x16xf32> -> vector<64x16xf32>
    %cst_12 = arith.constant dense<0xFF800000> : vector<64xf32>
    %45 = vector.multi_reduction <maximumf>, %44, %cst_12 [1] : vector<64x16xf32> to vector<64xf32>
    %46 = vector.shape_cast %45 : vector<64xf32> to vector<64x1xf32>
    %47 = vector.broadcast %46 : vector<64x1xf32> to vector<64x16xf32>
    %48 = arith.subf %44, %47 : vector<64x16xf32>
    %49 = math.exp %48 : vector<64x16xf32>
    %cst_13 = arith.constant dense<0.000000e+00> : vector<64xf32>
    %50 = vector.multi_reduction <add>, %49, %cst_13 [1] : vector<64x16xf32> to vector<64xf32>
    %51 = vector.shape_cast %50 : vector<64xf32> to vector<64x1xf32>
    %52 = tpu.reciprocal %51 : vector<64x1xf32> -> vector<64x1xf32>
    %53 = vector.broadcast %52 : vector<64x1xf32> to vector<64x16xf32>
    %54 = arith.mulf %49, %53 : vector<64x16xf32>
    %cst_14 = arith.constant 0.000000e+00 : f32
    %55 = vector.broadcast %cst_14 : f32 to vector<16x32xf32>
    %56 = vector.extract_strided_slice %54 {offsets = [0, 0], sizes = [16, 16], strides = [1, 1]} : vector<64x16xf32> to vector<16x16xf32>
    %57 = vector.extract_strided_slice %21 {offsets = [0, 0], sizes = [16, 32], strides = [1, 1]} : vector<16x128xf32> to vector<16x32xf32>
    %cst_15 = arith.constant dense<0.000000e+00> : vector<16x32xf32>
    %58 = tpu.matmul %56, %57, %cst_15 {dimension_numbers = #tpu.dot_dimension_numbers<[1], [0], [0], [1], [0, 0, 1, 1], [], []>, precision = #tpu.contract_precision<fp32>} : vector<16x16xf32>, vector<16x32xf32>, vector<16x32xf32> -> vector<16x32xf32>
    %59 = arith.addf %55, %58 : vector<16x32xf32>
    %60 = vector.extract_strided_slice %54 {offsets = [16, 0], sizes = [16, 16], strides = [1, 1]} : vector<64x16xf32> to vector<16x16xf32>
    %61 = vector.extract_strided_slice %21 {offsets = [0, 32], sizes = [16, 32], strides = [1, 1]} : vector<16x128xf32> to vector<16x32xf32>
    %cst_16 = arith.constant dense<0.000000e+00> : vector<16x32xf32>
    %62 = tpu.matmul %60, %61, %cst_16 {dimension_numbers = #tpu.dot_dimension_numbers<[1], [0], [0], [1], [0, 0, 1, 1], [], []>, precision = #tpu.contract_precision<fp32>} : vector<16x16xf32>, vector<16x32xf32>, vector<16x32xf32> -> vector<16x32xf32>
    %63 = arith.addf %59, %62 : vector<16x32xf32>
    %64 = vector.extract_strided_slice %54 {offsets = [32, 0], sizes = [16, 16], strides = [1, 1]} : vector<64x16xf32> to vector<16x16xf32>
    %65 = vector.extract_strided_slice %21 {offsets = [0, 64], sizes = [16, 32], strides = [1, 1]} : vector<16x128xf32> to vector<16x32xf32>
    %cst_17 = arith.constant dense<0.000000e+00> : vector<16x32xf32>
    %66 = tpu.matmul %64, %65, %cst_17 {dimension_numbers = #tpu.dot_dimension_numbers<[1], [0], [0], [1], [0, 0, 1, 1], [], []>, precision = #tpu.contract_precision<fp32>} : vector<16x16xf32>, vector<16x32xf32>, vector<16x32xf32> -> vector<16x32xf32>
    %67 = arith.addf %63, %66 : vector<16x32xf32>
    %68 = vector.extract_strided_slice %54 {offsets = [48, 0], sizes = [16, 16], strides = [1, 1]} : vector<64x16xf32> to vector<16x16xf32>
    %69 = vector.extract_strided_slice %21 {offsets = [0, 96], sizes = [16, 32], strides = [1, 1]} : vector<16x128xf32> to vector<16x32xf32>
    %cst_18 = arith.constant dense<0.000000e+00> : vector<16x32xf32>
    %70 = tpu.matmul %68, %69, %cst_18 {dimension_numbers = #tpu.dot_dimension_numbers<[1], [0], [0], [1], [0, 0, 1, 1], [], []>, precision = #tpu.contract_precision<fp32>} : vector<16x16xf32>, vector<16x32xf32>, vector<16x32xf32> -> vector<16x32xf32>
    %71 = arith.addf %67, %70 : vector<16x32xf32>
    %72 = arith.addf %0, %71 : vector<16x32xf32>
    %73 = arith.mulf %72, %72 : vector<16x32xf32>
    %cst_19 = arith.constant dense<0.000000e+00> : vector<16xf32>
    %74 = vector.multi_reduction <add>, %73, %cst_19 [1] : vector<16x32xf32> to vector<16xf32>
    %75 = vector.shape_cast %74 : vector<16xf32> to vector<16x1xf32>
    %cst_20 = arith.constant 3.200000e+01 : f32
    %76 = vector.broadcast %cst_20 : f32 to vector<16x1xf32>
    %77 = arith.divf %75, %76 : vector<16x1xf32>
    %cst_21 = arith.constant 9.99999997E-7 : f32
    %78 = vector.broadcast %cst_21 : f32 to vector<16x1xf32>
    %79 = arith.addf %77, %78 : vector<16x1xf32>
    %80 = math.rsqrt %79 : vector<16x1xf32>
    %81 = vector.broadcast %80 : vector<16x1xf32> to vector<16x32xf32>
    %82 = arith.mulf %72, %81 : vector<16x32xf32>
    %c0_22 = arith.constant 0 : index
    %c0_23 = arith.constant 0 : index
    %83 = vector.load %arg4[%c0_22, %c0_23] : memref<32x128xf32, #tpu.memory_space<vmem>>, vector<32x128xf32>
    %cst_24 = arith.constant dense<0.000000e+00> : vector<16x128xf32>
    %84 = tpu.matmul %82, %83, %cst_24 {dimension_numbers = #tpu.dot_dimension_numbers<[1], [0], [0], [1], [0, 0, 1, 1], [], []>, precision = #tpu.contract_precision<fp32>} : vector<16x32xf32>, vector<32x128xf32>, vector<16x128xf32> -> vector<16x128xf32>
    %85 = vector.extract_strided_slice %84 {offsets = [0, 0], sizes = [16, 64], strides = [1, 1]} : vector<16x128xf32> to vector<16x64xf32>
    %86 = vector.extract_strided_slice %84 {offsets = [0, 64], sizes = [16, 64], strides = [1, 1]} : vector<16x128xf32> to vector<16x64xf32>
    %87 = arith.negf %85 : vector<16x64xf32>
    %88 = math.exp %87 : vector<16x64xf32>
    %cst_25 = arith.constant 1.000000e+00 : f32
    %89 = vector.broadcast %cst_25 : f32 to vector<16x64xf32>
    %90 = arith.addf %89, %88 : vector<16x64xf32>
    %91 = arith.divf %89, %90 : vector<16x64xf32>
    %92 = arith.mulf %85, %91 : vector<16x64xf32>
    %93 = arith.mulf %92, %86 : vector<16x64xf32>
    %c0_26 = arith.constant 0 : index
    %c0_27 = arith.constant 0 : index
    %94 = vector.load %arg5[%c0_26, %c0_27] : memref<64x32xf32, #tpu.memory_space<vmem>>, vector<64x32xf32>
    %cst_28 = arith.constant dense<0.000000e+00> : vector<16x32xf32>
    %95 = tpu.matmul %93, %94, %cst_28 {dimension_numbers = #tpu.dot_dimension_numbers<[1], [0], [0], [1], [0, 0, 1, 1], [], []>, precision = #tpu.contract_precision<fp32>} : vector<16x64xf32>, vector<64x32xf32>, vector<16x32xf32> -> vector<16x32xf32>
    %96 = arith.addf %72, %95 : vector<16x32xf32>
    %c0_29 = arith.constant 0 : index
    %c0_30 = arith.constant 0 : index
    %97 = vector.load %arg6[%c0_29, %c0_30] : memref<16x32xf32, #tpu.memory_space<vmem>>, vector<16x32xf32>
    tpu.vector_store %arg6[%c0_29, %c0_30], %96 {strides = array<i32>} : memref<16x32xf32, #tpu.memory_space<vmem>>, vector<16x32xf32>,
    return
  }
  func.func @transform_0(%arg0: i32) -> (i32, i32) {
    %c0_i32 = arith.constant 0 : i32
    %c0_i32_0 = arith.constant 0 : i32
    %c0_i32_1 = arith.constant 0 : i32
    return %c0_i32, %c0_i32_0 : i32, i32
  }
  func.func @transform_1(%arg0: i32) -> (i32, i32) {
    %c0_i32 = arith.constant 0 : i32
    %c0_i32_0 = arith.constant 0 : i32
    %c0_i32_1 = arith.constant 0 : i32
    return %c0_i32, %c0_i32_0 : i32, i32
  }
  func.func @transform_2(%arg0: i32) -> (i32, i32) {
    %c0_i32 = arith.constant 0 : i32
    %c0_i32_0 = arith.constant 0 : i32
    %c0_i32_1 = arith.constant 0 : i32
    return %c0_i32, %c0_i32_0 : i32, i32
  }
  func.func @transform_3(%arg0: i32) -> (i32, i32) {
    %c0_i32 = arith.constant 0 : i32
    %c0_i32_0 = arith.constant 0 : i32
    %c0_i32_1 = arith.constant 0 : i32
    return %c0_i32, %c0_i32_0 : i32, i32
  }
  func.func @transform_4(%arg0: i32) -> (i32, i32) {
    %c0_i32 = arith.constant 0 : i32
    %c0_i32_0 = arith.constant 0 : i32
    %c0_i32_1 = arith.constant 0 : i32
    return %c0_i32, %c0_i32_0 : i32, i32
  }
  func.func @transform_5(%arg0: i32) -> (i32, i32) {
    %c0_i32 = arith.constant 0 : i32
    %c0_i32_0 = arith.constant 0 : i32
    %c0_i32_1 = arith.constant 0 : i32
    return %c0_i32, %c0_i32_0 : i32, i32
  }
}

</mosaic_0001>

<bundles_post_ra>
// kernel: tile.13
= control target key start
LH: loop header
LB: loop body
LE: loop exit
PB: predicated region body
PF: predicated region fallthrough
CT: control target
= control target key end

     0   :  { %s154_s0 = inlined_call_operand.vmem [shape: f32[8,8], index: 0, kind: input, shape index: {}]   ;;  %s155_s1 = inlined_call_operand.vmem [shape: f32[2,8,4,8], index: 1, kind: output, shape index: {}]  }
   0x1   :  { %v4_v0 = vld [vmem:[%s154_s0] ss:$0 sm:$0xff]  ;;  %v51_v1 = vld [vmem:[%s154_s0 + $0x1] ss:$0 sm:$0xff]  ;;  %v54_v2 = vld [vmem:[%s154_s0 + $0x2] ss:$0 sm:$0xff] }
   0x2   :  { %5 = vst [vmem:[%s155_s1] sm:$0xf] %v4_v0  ;;  %50 = vst [vmem:[%s155_s1 + $0x20] sm:$0xf] %v4_v0  ;;  %v57_v3 = vld [vmem:[%s154_s0 + $0x3] ss:$0 sm:$0xff] }
   0x3   :  { %52 = vst [vmem:[%s155_s1 + $0x4] sm:$0xf] %v51_v1  ;;  %53 = vst [vmem:[%s155_s1 + $0x24] sm:$0xf] %v51_v1  ;;  %v60_v4 = vld [vmem:[%s154_s0 + $0x4] ss:$0 sm:$0xff] }
   0x4   :  { %55 = vst [vmem:[%s155_s1 + $0x8] sm:$0xf] %v54_v2  ;;  %56 = vst [vmem:[%s155_s1 + $0x28] sm:$0xf] %v54_v2  ;;  %v63_v5 = vld [vmem:[%s154_s0 + $0x5] ss:$0 sm:$0xff] }
   0x5   :  { %58 = vst [vmem:[%s155_s1 + $0xc] sm:$0xf] %v57_v3  ;;  %59 = vst [vmem:[%s155_s1 + $0x2c] sm:$0xf] %v57_v3  ;;  %v66_v6 = vld [vmem:[%s154_s0 + $0x6] ss:$0 sm:$0xff] }
   0x6   :  { %61 = vst [vmem:[%s155_s1 + $0x10] sm:$0xf] %v60_v4  ;;  %62 = vst [vmem:[%s155_s1 + $0x30] sm:$0xf] %v60_v4  ;;  %v69_v7 = vld [vmem:[%s154_s0 + $0x7] ss:$0 sm:$0xff] }
   0x7   :  { %64 = vst [vmem:[%s155_s1 + $0x14] sm:$0xf] %v63_v5  ;;  %65 = vst [vmem:[%s155_s1 + $0x34] sm:$0xf] %v63_v5 }
   0x8   :  { %67 = vst [vmem:[%s155_s1 + $0x18] sm:$0xf] %v66_v6  ;;  %68 = vst [vmem:[%s155_s1 + $0x38] sm:$0xf] %v66_v6 }
   0x9   :  { %70 = vst [vmem:[%s155_s1 + $0x1c] sm:$0xf] %v69_v7  ;;  %71 = vst [vmem:[%s155_s1 + $0x3c] sm:$0xf] %v69_v7 }

// kernel: tile.14
= control target key start
LH: loop header
LB: loop body
LE: loop exit
PB: predicated region body
PF: predicated region fallthrough
CT: control target
= control target key end

     0   :  { %vm82_vm0 = vcmask 1047556   ;;  %vm84_vm1 = vcmask 64512   ;;  %s195_s9 = smov 24   ;;  %s196_s14 = smov 8   ;;  %vm103_vm2 = vcmask 261312   ;;  %vm124_vm3 = vcmask 195712   ;;  %s289_s0 = inlined_call_operand.vmem [shape: f32[2,8,4,8], index: 0, kind: input, shape index: {}]   ;;  %s290_s1 = inlined_call_operand.vmem [shape: f32[16,32], index: 1, kind: output, shape index: {}]  }
   0x1   :  { %v180_v0 = vld [vmem:[%s289_s0 + $0x1c] sm:$0xf]  ;;  %v181_v1 = vld [vmem:[%s289_s0 + $0x18] sm:$0xf]  ;;  %v182_v2 = vld [vmem:[%s289_s0 + $0x14] sm:$0xf] }
   0x2   :  { %48 = vst [vmem:[#allocation0 + $0x38] sm:$0xf] %v180_v0  ;;  %53 = vst [vmem:[#allocation0 + $0x30] sm:$0xf] %v181_v1  ;;  %v183_v3 = vld [vmem:[%s289_s0 + $0x10] sm:$0xf] }
   0x3   :  { %58 = vst [vmem:[#allocation0 + $0x28] sm:$0xf] %v182_v2  ;;  %v184_v4 = vld [vmem:[%s289_s0 + $0xc] sm:$0xf]  ;;  %v185_v5 = vld [vmem:[%s289_s0 + $0x8] sm:$0xf] }
   0x4   :  { %63 = vst [vmem:[#allocation0 + $0x20] sm:$0xf] %v183_v3  ;;  %68 = vst [vmem:[#allocation0 + $0x18] sm:$0xf] %v184_v4  ;;  %v186_v6 = vld [vmem:[%s289_s0 + $0x4] sm:$0xf] }
   0x5   :  { %73 = vst [vmem:[#allocation0 + $0x10] sm:$0xf] %v185_v5  ;;  %v78_v7 = vld [vmem:[%s289_s0] sm:$0xf]  ;;  %77 = vst [vmem:[#allocation0 + $0x8] sm:$0xf] %v186_v6 }
   0x6   :  { %79 = vst [vmem:[#allocation0] sm:$0xf] %v78_v7  ;;  %v172_v8 = vld [vmem:[%s289_s0 + $0x3c] sm:$0xf]  ;;  %v173_v9 = vld [vmem:[%s289_s0 + $0x38] sm:$0xf] }
   0x7   :  { %8 = vst [vmem:[#allocation0 + $0x78] sm:$0xf] %v172_v8  ;;  %13 = vst [vmem:[#allocation0 + $0x70] sm:$0xf] %v173_v9  ;;  %v174_v10 = vld [vmem:[%s289_s0 + $0x34] sm:$0xf] }
   0x8   :  { %v175_v11 = vld [vmem:[%s289_s0 + $0x30] sm:$0xf]  ;;  %v176_v12 = vld [vmem:[%s289_s0 + $0x2c] sm:$0xf]  ;;  %18 = vst [vmem:[#allocation0 + $0x68] sm:$0xf] %v174_v10 }
   0x9   :  { %23 = vst [vmem:[#allocation0 + $0x60] sm:$0xf] %v175_v11  ;;  %28 = vst [vmem:[#allocation0 + $0x58] sm:$0xf] %v176_v12  ;;  %v177_v13 = vld [vmem:[%s289_s0 + $0x28] sm:$0xf] }
   0xa   :  { %v178_v14 = vld [vmem:[%s289_s0 + $0x24] sm:$0xf]  ;;  %v179_v15 = vld [vmem:[%s289_s0 + $0x20] sm:$0xf]  ;;  %33 = vst [vmem:[#allocation0 + $0x50] sm:$0xf] %v177_v13 }
   0xb   :  { %38 = vst [vmem:[#allocation0 + $0x48] sm:$0xf] %v178_v14  ;;  %43 = vst [vmem:[#allocation0 + $0x40] sm:$0xf] %v179_v15  ;;  %s194_s0 = smov 16   ;;  %vm145_vm4 = vcmask 130112  }
   0xc   :  { %v119_v16 = vld [vmem:[#allocation0 + $0x2] ss:$8 sm:$0xf0]   ;;  %v98_v17 = vld [vmem:[#allocation0 + $0x3] ss:$8 sm:$0xf0]  }
   0xd   :  { %v117_v18 = vld [vmem:[#allocation0 + $0x2] ss:$8 sm:$0xf]   ;;  %v96_v19 = vld [vmem:[#allocation0 + $0x3] ss:$8 sm:$0xf]  }
   0xe   :  { %v121_v20 = vsel %vm82_vm0, %v119_v16, %v117_v18  ;;  %v100_v21 = vsel %vm82_vm0, %v98_v17, %v96_v19  ;;  %v138_v24 = vld [vmem:[#allocation0 + $0x1] ss:$8 sm:$0xf]   ;;  %v80_v32 = vld [vmem:[#allocation0] ss:$8 sm:$0xf]  }
   0xf   :  { %122 = vrot.lane.b32.xlu1 %v121_v20, %s194_s0  ;;  %101 = vrot.lane.b32.xlu0 %v100_v21, %s195_s9  ;;  %v140_v25 = vld [vmem:[#allocation0 + $0x1] ss:$8 sm:$0xf0]   ;;  %v81_v33 = vld [vmem:[#allocation0] ss:$8 sm:$0xf0]  }
  0x10   :  { %v129_v22 = vld [vmem:[#allocation0 + $0x42] ss:$8 sm:$0xf0]   ;;  %v108_v23 = vld [vmem:[#allocation0 + $0x43] ss:$8 sm:$0xf0]   ;;  %v83_v34 = vsel %vm82_vm0, %v81_v33, %v80_v32  ;;  %v142_v38 = vsel %vm82_vm0, %v140_v25, %v138_v24 }
  0x11   :  { %v150_v31 = vld [vmem:[#allocation0 + $0x41] ss:$8 sm:$0xf0]   ;;  %v89_v36 = vld [vmem:[#allocation0 + $0x40] ss:$8 sm:$0xf0]  }
  0x12   :  { %v127_v26 = vld [vmem:[#allocation0 + $0x42] ss:$8 sm:$0xf]   ;;  %v106_v27 = vld [vmem:[#allocation0 + $0x43] ss:$8 sm:$0xf]  }
  0x13   :  { %v131_v28 = vsel %vm82_vm0, %v129_v22, %v127_v26  ;;  %v110_v29 = vsel %vm82_vm0, %v108_v23, %v106_v27  ;;  %v148_v30 = vld [vmem:[#allocation0 + $0x41] ss:$8 sm:$0xf]   ;;  %v87_v35 = vld [vmem:[#allocation0 + $0x40] ss:$8 sm:$0xf]  }
  0x14   :  { %132 = vrot.lane.b32.xlu1 %v131_v28, %s194_s0  ;;  %111 = vrot.lane.b32.xlu0 %v110_v29, %s195_s9  ;;  %v152_v37 = vsel %vm82_vm0, %v150_v31, %v148_v30  ;;  %85 = vst.msk [vmem:[%s290_s1] sm:$0xff] %vm84_vm1, %v83_v34   ;;  %v91_v39 = vsel %vm82_vm0, %v89_v36, %v87_v35 }
  0x15   :  { %187 = vst.msk [vmem:[%s290_s1 + $0x8] sm:$0xff] %vm84_vm1, %v91_v39  }
  0x18   :  { %153 = vrot.lane.b32.xlu1 %v152_v37, %s196_s14  ;;  %143 = vrot.lane.b32.xlu0 %v142_v38, %s196_s14 }
  0x81   :  { %v123_v40 = vpop.permute.xlu1 %122   ;;  %v102_v41 = vpop.permute.xlu0 %101  }
  0x82   :  { %104 = vst.msk [vmem:[%s290_s1] sm:$0xff] %vm103_vm2, %v102_v41  }
  0x83   :  { %125 = vst.msk [vmem:[%s290_s1] sm:$0xff] %vm124_vm3, %v123_v40  }
  0x86   :  { %v133_v42 = vpop.permute.xlu1 %132   ;;  %v112_v43 = vpop.permute.xlu0 %111  }
  0x87   :  { %188 = vst.msk [vmem:[%s290_s1 + $0x8] sm:$0xff] %vm103_vm2, %v112_v43  }
  0x88   :  { %189 = vst.msk [vmem:[%s290_s1 + $0x8] sm:$0xff] %vm124_vm3, %v133_v42  }
  0x8a   :  { %v154_v44 = vpop.permute.xlu1 %153   ;;  %v144_v45 = vpop.permute.xlu0 %143  }
  0x8b   :  { %190 = vst.msk [vmem:[%s290_s1 + $0x8] sm:$0xff] %vm145_vm4, %v154_v44   ;;  %146 = vst.msk [vmem:[%s290_s1] sm:$0xff] %vm145_vm4, %v144_v45  }

// kernel: llama_decoder_layer.1
= control target key start
LH: loop header
LB: loop body
LE: loop exit
PB: predicated region body
PF: predicated region fallthrough
CT: control target
= control target key end

     0   :  { %vm31_vm0 = vcmask 261120   ;;  %s8219_s0 = inlined_call_operand.vmem [shape: f32[16,32], index: 0, kind: input, shape index: {}]   ;;  %s8220_s1 = inlined_call_operand.vmem [shape: f32[48,32], index: 1, kind: input, shape index: {}]   ;;  %s8221_s2 = inlined_call_operand.vmem [shape: f32[32,256], index: 2, kind: input, shape index: {}]   ;;  %s8222_s3 = inlined_call_operand.vmem [shape: f32[32,128], index: 3, kind: input, shape index: {}]   ;;  %s8223_s4 = inlined_call_operand.vmem [shape: f32[64,32], index: 4, kind: input, shape index: {}]   ;;  %s8224_s5 = inlined_call_operand.hbm [shape: f32[16,32], index: 5, kind: output, shape index: {}]  }
   0x1   :  { %v7573_v0 = vld [vmem:[%s8219_s0] sm:$0xff]  ;;  %v7578_v1 = vld [vmem:[%s8219_s0 + $0x8] sm:$0xff] }
   0x2   :  { %10 = vsyncpa [#allocation3], 0  ;;  %v29_v2 = vmul.f32 %v7573_v0, %v7573_v0  ;;  %v30_v3 = vmul.f32 %v7578_v1, %v7578_v1  ;;  %v48_v6 = vld [vmem:[%s8221_s2 + $0x8] sm:$0xff]  ;;  %v50_v7 = vld [vmem:[%s8221_s2 + $0x18] sm:$0xff]  ;;  %v7527_v15 = vmov 0.0   ;;  %s7528_s14 = smov 96  }
   0x3   :  { %v47_v8 = vld [vmem:[%s8221_s2] sm:$0xff]  ;;  %v61_v9 = vand.u32 4294901760, %v48_v6  ;;  %v65_v10 = vand.u32 4294901760, %v50_v7  ;;  %v49_v11 = vld [vmem:[%s8221_s2 + $0x10] sm:$0xff]  ;;  %v52_v13 = vld [vmem:[%s8221_s2 + $0x28] sm:$0xff]  ;;  %133 = vmatprep.mubr.f32.mxu0 %v7527_v15  ;;  %s7529_s15 = smov 64  }
   0x4   :  { %v32_v4 = vsel %vm31_vm0, %v29_v2, 0.0  ;;  %v35_v5 = vsel %vm31_vm0, %v30_v3, 0.0  ;;  %v63_v12 = vand.u32 4294901760, %v47_v8  ;;  %v54_v14 = vld [vmem:[%s8221_s2 + $0x38] sm:$0xff]  ;;  %v67_v16 = vand.u32 4294901760, %v49_v11  ;;  %v51_v19 = vld [vmem:[%s8221_s2 + $0x20] sm:$0xff] }
   0x5   :  { %33 = vadd.xlane.f32.xlu0 %v32_v4  ;;  %v69_v17 = vand.u32 4294901760, %v52_v13  ;;  %v73_v18 = vand.u32 4294901760, %v54_v14  ;;  %v53_v20 = vld [vmem:[%s8221_s2 + $0x30] sm:$0xff]  ;;  %v7611_v21 = vpack.c.bf16 %v65_v10, %v61_v9  ;;  %v7613_v22 = vsub.f32 %v48_v6, %v61_v9  ;;  %s7530_s20 = smov 32   ;;  %s7531_s23 = smov 88  }
   0x6   :  { %v7615_v23 = vsub.f32 %v50_v7, %v65_v10  ;;  %v7617_v24 = vsub.f32 %v47_v8, %v63_v12  ;;  %v7619_v25 = vpack.c.bf16 %v67_v16, %v63_v12  ;;  %v7621_v26 = vsub.f32 %v49_v11, %v67_v16  ;;  %v25_v9 = vld [vmem:[%s8220_s1 + $0x10] sm:$0xff]  ;;  %v26_v10 = vld [vmem:[%s8220_s1 + $0x18] sm:$0xff]  ;;  %v7684_v11 = vld [vmem:[%s8220_s1] sm:$0xff]  ;;  %s7532_s24 = smov 120   ;;  %s7533_s25 = smov 80  }
   0x7   :  { %v7623_v27 = vpack.c.bf16 %v73_v18, %v69_v17  ;;  %v7625_v28 = vsub.f32 %v52_v13, %v69_v17  ;;  %6923 = vmatprep.subr.bf16.mxu0 %v7611_v21  ;;  %v7628_v29 = vsub.f32 %v54_v14, %v73_v18  ;;  %v71_v30 = vand.u32 4294901760, %v51_v19  ;;  %685 = vrot.lane.b32.xlu1 %v25_v9, %s7528_s14  ;;  %v7691_v12 = vld [vmem:[%s8220_s1 + $0x8] sm:$0xff]  ;;  %s7534_s26 = smov 112   ;;  %s7535_s27 = smov 72  }
   0x8   :  { %v75_v31 = vand.u32 4294901760, %v53_v20  ;;  %v158_v32 = vand.u32 4294901760, %v7613_v22  ;;  %6925 = vmatpush1.bf16.msra.mxu0 %v7619_v25  ;;  %v170_v33 = vand.u32 4294901760, %v7615_v23  ;;  %v164_v42 = vand.u32 4294901760, %v7617_v24  ;;  %s7536_s28 = smov 104  }
   0x9   :  { %36 = vadd.xlane.f32.xlu0 %v35_v5  ;;  %6927 = vmatprep.subr.bf16.mxu0 %v7623_v27  ;;  %v7636_v35 = vsub.f32 %v51_v19, %v71_v30  ;;  %v176_v43 = vand.u32 4294901760, %v7621_v26  ;;  %v182_v46 = vand.u32 4294901760, %v7625_v28  ;;  %v194_v47 = vand.u32 4294901760, %v7628_v29 }
   0xa   :  { %v7634_v34 = vpack.c.bf16 %v75_v31, %v71_v30  ;;  %v7638_v36 = vsub.f32 %v53_v20, %v75_v31  ;;  %v159_v37 = vsub.f32 %v7613_v22, %v158_v32  ;;  %v171_v38 = vsub.f32 %v7615_v23, %v170_v33 }
   0xb   :  { %v165_v44 = vsub.f32 %v7617_v24, %v164_v42  ;;  %v177_v45 = vsub.f32 %v7621_v26, %v176_v43  ;;  %v188_v50 = vand.u32 4294901760, %v7636_v35  ;;  %v183_v52 = vsub.f32 %v7625_v28, %v182_v46  ;;  %687 = vrot.lane.b32.xlu1 %v26_v10, %s7528_s14 }
   0xc   :  { %v160_v39 = vand.u32 4294901760, %v159_v37  ;;  %6929 = vmatpush1.bf16.msra.mxu0 %v7634_v34  ;;  %v172_v40 = vand.u32 4294901760, %v171_v38  ;;  %v200_v51 = vand.u32 4294901760, %v7638_v36  ;;  %v195_v53 = vsub.f32 %v7628_v29, %v194_v47 }
   0xd   :  { %v166_v48 = vand.u32 4294901760, %v165_v44  ;;  %v178_v49 = vand.u32 4294901760, %v177_v45  ;;  %v189_v55 = vsub.f32 %v7636_v35, %v188_v50  ;;  %v184_v57 = vand.u32 4294901760, %v183_v52 }
   0xe   :  { %v6930_v41 = vpack.c.bf16 %v172_v40, %v160_v39  ;;  %v201_v56 = vsub.f32 %v7638_v36, %v200_v51  ;;  %v196_v58 = vand.u32 4294901760, %v195_v53  ;;  %v6938_v63 = vpack.c.bf16 %v7615_v23, %v7613_v22 }
   0xf   :  { %v6932_v54 = vpack.c.bf16 %v178_v49, %v166_v48  ;;  %v190_v59 = vand.u32 4294901760, %v189_v55  ;;  %v6940_v2 = vpack.c.bf16 %v7621_v26, %v7617_v24  ;;  %v6942_v3 = vpack.c.bf16 %v7628_v29, %v7625_v28  ;;  %659 = vrot.lane.b32.xlu1 %v26_v10, %s7529_s15 }
  0x10   :  { %6931 = vmatprep.subr.bf16.mxu0 %v6930_v41  ;;  %v202_v60 = vand.u32 4294901760, %v201_v56  ;;  %v6934_v61 = vpack.c.bf16 %v196_v58, %v184_v57  ;;  %v6944_v4 = vpack.c.bf16 %v7638_v36, %v7636_v35  ;;  %v7663_v5 = vpack.c.bf16 %v170_v33, %v158_v32 }
  0x11   :  { %v7665_v6 = vpack.c.bf16 %v176_v43, %v164_v42  ;;  %v7667_v7 = vpack.c.bf16 %v194_v47, %v182_v46  ;;  %v7669_v8 = vpack.c.bf16 %v200_v51, %v188_v50  ;;  %vm709_vm1 = vcmask 64512  }
  0x12   :  { %v6936_v62 = vpack.c.bf16 %v202_v60, %v190_v59  ;;  %vm2776_vm2 = vcmask 130048   ;;  %vm5509_vm3 = vcmask 523264  }
  0x13   :  { %677 = vrot.lane.b32.xlu1 %v7684_v11, %s7530_s20 }
  0x17   :  { %679 = vrot.lane.b32.xlu1 %v7691_v12, %s7530_s20 }
  0x1f   :  { %657 = vrot.lane.b32.xlu0 %v25_v9, %s7529_s15 }
  0x92   :  { %v34_v13 = vpop.xlane.xlu0 %33 }
  0x93   :  { %v39_v14 = vmul.f32 0.03125, %v34_v13 }
  0x95   :  { %v41_v16 = vadd.f32 1e-06, %v39_v14 }
  0x96   :  { %v37_v17 = vpop.xlane.xlu0 %36 }
  0x97   :  { %7453 = vrsqrt.f32 %v41_v16  ;;  %v40_v18 = vmul.f32 0.03125, %v37_v17 }
  0x99   :  { %v42_v19 = vadd.f32 1e-06, %v40_v18 }
  0x9b   :  { %7455 = vrsqrt.f32 %v42_v19 }
  0xa1   :  { %v7454_v20 = vpop.eup %7453 }
  0xa2   :  { %v45_v22 = vmul.f32 %v7454_v20, %v7573_v0 }
  0xa4   :  { %v56_v23 = vsel %vm31_vm0, %v45_v22, 0 }
  0xa5   :  { %v7456_v24 = vpop.eup %7455  ;;  %v134_v26 = vand.u32 4294901760, %v56_v23 }
  0xa6   :  { %v46_v28 = vmul.f32 %v7456_v24, %v7578_v1  ;;  %v686_v1 = vpop.permute.xlu1 %685 }
  0xa7   :  { %v135_v29 = vsub.f32 %v56_v23, %v134_v26 }
  0xa8   :  { %v59_v30 = vsel %vm31_vm0, %v46_v28, 0 }
  0xa9   :  { %v136_v31 = vand.u32 4294901760, %v135_v29  ;;  %v145_v32 = vand.u32 4294901760, %v59_v30 }
  0xaa   :  { %v688_v39 = vpop.permute.xlu1 %687 }
  0xab   :  { %v137_v33 = vsub.f32 %v135_v29, %v136_v31  ;;  %v146_v35 = vsub.f32 %v59_v30, %v145_v32 }
  0xad   :  { %v138_v36 = vand.u32 4294901760, %v137_v33  ;;  %v147_v37 = vand.u32 4294901760, %v146_v35 }
  0xaf   :  { %139 = vmatmul.mubr.f32.vlgmr.msra.gmra.mrb[0].mxu0 %v138_v36  ;;  %v148_v38 = vsub.f32 %v146_v35, %v147_v37 }
  0xb0   :  { %6933 = vmatpush1.bf16.msra.mxu0 %v6932_v54  ;;  %144 = vmatprep.mubr.f32.mxu0 %v7527_v15 }
  0xb1   :  { %6935 = vmatprep.subr.bf16.mxu0 %v6934_v61  ;;  %v149_v0 = vand.u32 4294901760, %v148_v38 }
  0xb3   :  { %150 = vmatmul.mubr.f32.gmra.mrb[2].mxu0 %v149_v0 }
  0xb4   :  { %6937 = vmatpush1.bf16.msra.mxu0 %v6936_v62  ;;  %260 = vmatprep.mubr.f32.mxu0 %v7527_v15 }
  0xb5   :  { %6939 = vmatprep.subr.bf16.mxu0 %v6938_v63 }
  0xb7   :  { %262 = vmatmul.mubr.f32.vlgmr.msra.gmra.mrb[0].mxu0 %v134_v26 }
  0xb8   :  { %6941 = vmatpush1.bf16.msra.mxu0 %v6940_v2  ;;  %267 = vmatprep.mubr.f32.mxu0 %v7527_v15 }
  0xb9   :  { %6943 = vmatprep.subr.bf16.mxu0 %v6942_v3 }
  0xbb   :  { %269 = vmatmul.mubr.f32.gmra.mrb[2].mxu0 %v145_v32 }
  0xbc   :  { %6945 = vmatpush1.bf16.msra.mxu0 %v6944_v4  ;;  %355 = vmatprep.mubr.f32.mxu0 %v7527_v15 }
  0xbd   :  { %6947 = vmatprep.subr.bf16.mxu0 %v7611_v21 }
  0xbf   :  { %358 = vmatmul.mubr.f32.vlgmr.msra.gmra.mrb[0].mxu0 %v135_v29 }
  0xc0   :  { %6949 = vmatpush1.bf16.msra.mxu0 %v7619_v25  ;;  %363 = vmatprep.mubr.f32.mxu0 %v7527_v15 }
  0xc1   :  { %6951 = vmatprep.subr.bf16.mxu0 %v7623_v27 }
  0xc3   :  { %366 = vmatmul.mubr.f32.gmra.mrb[2].mxu0 %v146_v35 }
  0xc4   :  { %6953 = vmatpush1.bf16.msra.mxu0 %v7634_v34  ;;  %444 = vmatprep.mubr.f32.mxu0 %v7527_v15 }
  0xc5   :  { %6955 = vmatprep.subr.bf16.mxu0 %v7663_v5 }
  0xc7   :  { %448 = vmatmul.mubr.f32.vlgmr.msra.gmra.mrb[0].mxu0 %v136_v31 }
  0xc8   :  { %6957 = vmatpush1.bf16.msra.mxu0 %v7665_v6  ;;  %453 = vmatprep.mubr.f32.mxu0 %v7527_v15 }
  0xc9   :  { %6959 = vmatprep.subr.bf16.mxu0 %v7667_v7 }
  0xcb   :  { %457 = vmatmul.mubr.f32.gmra.mrb[2].mxu0 %v147_v37 }
  0xcc   :  { %6961 = vmatpush1.bf16.msra.mxu0 %v7669_v8  ;;  %551 = vmatprep.mubr.f32.mxu0 %v7527_v15 }
  0xcd   :  { %6963 = vmatprep.subr.bf16.mxu0 %v7611_v21 }
  0xcf   :  { %553 = vmatmul.mubr.f32.vlgmr.msra.gmra.mrb[0].mxu0 %v134_v26 }
  0xd0   :  { %6965 = vmatpush1.bf16.msra.mxu0 %v7619_v25  ;;  %558 = vmatprep.mubr.f32.mxu0 %v7527_v15 }
  0xd1   :  { %6967 = vmatprep.subr.bf16.mxu0 %v7623_v27  ;;  %v660_v27 = vpop.permute.xlu1 %659 }
  0xd3   :  { %560 = vmatmul.mubr.f32.gmra.mrb[2].mxu0 %v145_v32 }
  0xd4   :  { %6969 = vmatpush1.bf16.msra.mxu0 %v7634_v34  ;;  %638 = vmatprep.mubr.f32.mxu0 %v7527_v15 }
  0xd5   :  { %v678_v59 = vpop.permute.xlu1 %677 }
  0xd7   :  { %640 = vmatmul.mubr.f32.vlgmr.msra.gmra.mrb[0].mxu0 %v134_v26 }
  0xd8   :  { %645 = vmatprep.mubr.f32.mxu0 %v7527_v15  ;;  %v658_v15 = vpop.permute.xlu0 %657 }
  0xd9   :  { %v680_v60 = vpop.permute.xlu1 %679 }
  0xdb   :  { %647 = vmatmul.mubr.f32.gmra.mrb[2].mxu0 %v145_v32 }
 0x1aa   :  { %v641_v40 = vpop.f32.mrb[0].mxu0 }
 0x1ab   :  { %v7722_v21 = vpop.f32.mrb[1].mxu0  ;;  %v691_v41 = vmul.f32 %v686_v1, %v641_v40  ;;  %v663_v50 = vmul.f32 %v658_v15, %v641_v40  ;;  %v683_v61 = vmul.f32 %v678_v59, %v641_v40  ;;  %v653_v7 = vmul.f32 %v641_v40, %v7684_v11 }
 0x1ac   :  { %v3388_v25 = vand.u32 4294901760, %v7722_v21 }
 0x1ad   :  { %695 = vrot.lane.b32.xlu1 %v691_v41, %s7529_s15 }
 0x1ae   :  { %v3476_v42 = vsub.f32 %v7722_v21, %v3388_v25  ;;  %v648_v34 = vpop.f32.mrb[2].mxu0 }
 0x1af   :  { %v7727_v43 = vpop.f32.mrb[3].mxu0  ;;  %v692_v44 = vmul.f32 %v688_v39, %v648_v34  ;;  %v664_v45 = vmul.f32 %v660_v27, %v648_v34  ;;  %v684_v2 = vmul.f32 %v680_v60, %v648_v34  ;;  %v654_v6 = vmul.f32 %v648_v34, %v7691_v12 }
 0x1b0   :  { %v3391_v46 = vand.u32 4294901760, %v7727_v43  ;;  %v3477_v47 = vand.u32 4294901760, %v3476_v42 }
 0x1b1   :  { %697 = vrot.lane.b32.xlu1 %v692_v44, %s7529_s15  ;;  %669 = vrot.lane.b32.xlu0 %v664_v45, %s7529_s15 }
 0x1b2   :  { %v7732_v48 = vpack.c.bf16 %v3391_v46, %v3388_v25  ;;  %v3483_v49 = vsub.f32 %v7727_v43, %v3391_v46  ;;  %v3478_v51 = vsub.f32 %v3476_v42, %v3477_v47 }
 0x1b4   :  { %v3484_v52 = vand.u32 4294901760, %v3483_v49  ;;  %v7735_v53 = vpack.c.bf16 %v3483_v49, %v3476_v42  ;;  %v3479_v56 = vand.u32 4294901760, %v3478_v51 }
 0x1b5   :  { %667 = vrot.lane.b32.xlu1 %v663_v50, %s7529_s15 }
 0x1b6   :  { %v3485_v54 = vsub.f32 %v3483_v49, %v3484_v52  ;;  %v7738_v55 = vpack.c.bf16 %v3484_v52, %v3477_v47 }
 0x1b8   :  { %v3486_v57 = vand.u32 4294901760, %v3485_v54 }
 0x1ba   :  { %v7740_v58 = vpack.c.bf16 %v3486_v57, %v3479_v56 }
 0x21f   :  { %v696_v62 = vpop.permute.xlu1 %695 }
 0x220   :  { %v701_v63 = vadd.f32 %v696_v62, %v683_v61 }
 0x222   :  { %1226 = vrot.lane.b32.xlu1 %v701_v63, %s7531_s23 }
 0x223   :  { %v698_v3 = vpop.permute.xlu1 %697  ;;  %v670_v5 = vpop.permute.xlu0 %669 }
 0x224   :  { %v702_v4 = vadd.f32 %v698_v3, %v684_v2  ;;  %v674_v9 = vadd.f32 %v670_v5, %v654_v6 }
 0x226   :  { %1228 = vrot.lane.b32.xlu0 %v702_v4, %s7531_s23  ;;  %v714_v22 = vsel %vm709_vm1, %v674_v9, 0 }
 0x227   :  { %v668_v8 = vpop.permute.xlu1 %667  ;;  %v7761_v29 = vand.u32 4294901760, %v714_v22 }
 0x228   :  { %v673_v10 = vadd.f32 %v668_v8, %v653_v7 }
 0x229   :  { %v7781_v40 = vsub.f32 %v714_v22, %v7761_v29 }
 0x22a   :  { %1222 = vrot.lane.b32.xlu1 %v673_v10, %s7532_s24  ;;  %1224 = vrot.lane.b32.xlu0 %v674_v9, %s7532_s24  ;;  %v711_v13 = vsel %vm709_vm1, %v673_v10, 0 }
 0x22b   :  { %v7745_v14 = vand.u32 4294901760, %v711_v13  ;;  %v799_v52 = vand.u32 4294901760, %v7781_v40 }
 0x22d   :  { %v7748_v16 = vsub.f32 %v711_v13, %v7745_v14  ;;  %v800_v6 = vsub.f32 %v7781_v40, %v799_v52 }
 0x22e   :  { %705 = vrot.lane.b32.xlu1 %v701_v63, %s7528_s14  ;;  %707 = vrot.lane.b32.xlu0 %v702_v4, %s7528_s14 }
 0x22f   :  { %v789_v11 = vand.u32 4294901760, %v7748_v16 }
 0x231   :  { %v790_v12 = vsub.f32 %v7748_v16, %v789_v11 }
 0x232   :  { %1744 = vrot.lane.b32.xlu1 %v701_v63, %s7533_s25  ;;  %1746 = vrot.lane.b32.xlu0 %v702_v4, %s7533_s25 }
 0x233   :  { %v791_v17 = vand.u32 4294901760, %v790_v12  ;;  %v801_v12 = vand.u32 4294901760, %v800_v6 }
 0x235   :  { %6410 = vmatprep.mubr.f32.mxu1 %v791_v17 }
 0x236   :  { %1740 = vrot.lane.b32.xlu1 %v673_v10, %s7534_s26  ;;  %1742 = vrot.lane.b32.xlu0 %v674_v9, %s7534_s26 }
 0x23a   :  { %2262 = vrot.lane.b32.xlu1 %v701_v63, %s7535_s27  ;;  %2264 = vrot.lane.b32.xlu0 %v702_v4, %s7535_s27 }
 0x23e   :  { %2258 = vrot.lane.b32.xlu1 %v673_v10, %s7536_s28  ;;  %2260 = vrot.lane.b32.xlu0 %v674_v9, %s7536_s28 }
 0x294   :  { %v1227_v18 = vpop.permute.xlu1 %1226 }
 0x295   :  { %v1234_v19 = vsel %vm709_vm1, %v1227_v18, 0 }
 0x296   :  { %v1239_v20 = vand.u32 4294901760, %v1234_v19 }
 0x298   :  { %v7758_v23 = vsub.f32 %v1234_v19, %v1239_v20  ;;  %v1229_v24 = vpop.permute.xlu0 %1228 }
 0x299   :  { %v1236_v26 = vsel %vm709_vm1, %v1229_v24, 0 }
 0x29a   :  { %v1242_v28 = vand.u32 4294901760, %v1236_v26  ;;  %v1328_v30 = vand.u32 4294901760, %v7758_v23 }
 0x29c   :  { %v7764_v31 = vpack.c.bf16 %v1242_v28, %v1239_v20  ;;  %v7766_v32 = vsub.f32 %v1236_v26, %v1242_v28  ;;  %v1223_v33 = vpop.permute.xlu1 %1222  ;;  %v1225_v35 = vpop.permute.xlu0 %1224  ;;  %v1329_v39 = vsub.f32 %v7758_v23, %v1328_v30 }
 0x29d   :  { %v1230_v36 = vsel %vm709_vm1, %v1223_v33, 0  ;;  %v1232_v37 = vsel %vm709_vm1, %v1225_v35, 0 }
 0x29e   :  { %v1335_v38 = vand.u32 4294901760, %v7766_v32  ;;  %v7771_v0 = vand.u32 4294901760, %v1230_v36  ;;  %v7773_v1 = vand.u32 4294901760, %v1232_v37  ;;  %6995 = vmatprep.subr.bf16.mxu0 %v7764_v31  ;;  %v1330_v50 = vand.u32 4294901760, %v1329_v39 }
 0x29f   :  { %6997 = vmatpush3.bf16.xpose.msra.mxu0 %v7764_v31  ;;  %v7002_v8 = vpack.c.bf16 %v7766_v32, %v7758_v23 }
 0x2a0   :  { %v1336_v41 = vsub.f32 %v7766_v32, %v1335_v38  ;;  %v7787_v25 = vsub.f32 %v1230_v36, %v7771_v0  ;;  %v7790_v27 = vsub.f32 %v1232_v37, %v7773_v1  ;;  %v706_v42 = vpop.permute.xlu1 %705  ;;  %v708_v34 = vpop.permute.xlu0 %707  ;;  %v7010_v26 = vpack.c.bf16 %v1335_v38, %v1328_v30 }
 0x2a1   :  { %v716_v44 = vsel %vm709_vm1, %v706_v42, 0  ;;  %v718_v45 = vsel %vm709_vm1, %v708_v34, 0 }
 0x2a2   :  { %v1307_v15 = vand.u32 4294901760, %v7787_v25  ;;  %v1317_v46 = vand.u32 4294901760, %v7790_v27  ;;  %v721_v47 = vand.u32 4294901760, %v716_v44  ;;  %v724_v49 = vand.u32 4294901760, %v718_v45 }
 0x2a3   :  { %v1337_v51 = vand.u32 4294901760, %v1336_v41 }
 0x2a4   :  { %v1318_v54 = vsub.f32 %v7790_v27, %v1317_v46  ;;  %v809_v56 = vsub.f32 %v716_v44, %v721_v47  ;;  %v7800_v57 = vpack.c.bf16 %v724_v49, %v721_v47  ;;  %v816_v59 = vsub.f32 %v718_v45, %v724_v49  ;;  %v1745_v7 = vpop.permute.xlu1 %1744  ;;  %v1747_v13 = vpop.permute.xlu0 %1746 }
 0x2a5   :  { %v6998_v60 = vpack.c.bf16 %v1337_v51, %v1330_v50  ;;  %v1308_v61 = vsub.f32 %v7787_v25, %v1307_v15  ;;  %v1752_v23 = vsel %vm709_vm1, %v1745_v7, 0  ;;  %v1754_v30 = vsel %vm709_vm1, %v1747_v13, 0 }
 0x2a6   :  { %v1319_v62 = vand.u32 4294901760, %v1318_v54  ;;  %v810_v63 = vand.u32 4294901760, %v809_v56  ;;  %v817_v2 = vand.u32 4294901760, %v816_v59  ;;  %6971 = vmatprep.subr.bf16.mxu1 %v7800_v57  ;;  %v6978_v19 = vpack.c.bf16 %v816_v59, %v809_v56 }
 0x2a7   :  { %6999 = vmatprep.subr.bf16.mxu0 %v6998_v60  ;;  %6973 = vmatpush3.bf16.xpose.msra.mxu1 %v7800_v57  ;;  %v1309_v3 = vand.u32 4294901760, %v1308_v61  ;;  %v1757_v34 = vand.u32 4294901760, %v1752_v23  ;;  %v1760_v44 = vand.u32 4294901760, %v1754_v30 }
 0x2a8   :  { %v811_v4 = vsub.f32 %v809_v56, %v810_v63  ;;  %v818_v5 = vsub.f32 %v816_v59, %v817_v2  ;;  %v1741_v18 = vpop.permute.xlu1 %1740  ;;  %v1743_v20 = vpop.permute.xlu0 %1742  ;;  %v6986_v41 = vpack.c.bf16 %v817_v2, %v810_v63 }
 0x2a9   :  { %6452 = vmatprep.mubr.f32.mxu0 %v1309_v3  ;;  %v1748_v45 = vsel %vm709_vm1, %v1741_v18, 0  ;;  %v7854_v49 = vsub.f32 %v1754_v30, %v1760_v44  ;;  %v1750_v51 = vsel %vm709_vm1, %v1743_v20, 0 }
 0x2aa   :  { %6453 = vmatmul.mubr.f32.vlgmr.msra.gmra.mrb[4].mxu0 %v1319_v62  ;;  %v812_v9 = vand.u32 4294901760, %v811_v4  ;;  %v819_v10 = vand.u32 4294901760, %v818_v5  ;;  %v7884_v63 = vand.u32 4294901760, %v1750_v51 }
 0x2ab   :  { %7001 = vmatpush3.bf16.xpose.msra.mxu0 %v6998_v60  ;;  %6459 = vmatprep.mubr.f32.mxu0 %v7771_v0  ;;  %v1853_v61 = vand.u32 4294901760, %v7854_v49 }
 0x2ac   :  { %7003 = vmatprep.subr.bf16.mxu0 %v7002_v8  ;;  %v6974_v17 = vpack.c.bf16 %v819_v10, %v812_v9  ;;  %v2263_v22 = vpop.permute.xlu1 %2262  ;;  %v2265_v24 = vpop.permute.xlu0 %2264 }
 0x2ad   :  { %v2270_v28 = vsel %vm709_vm1, %v2263_v22, 0  ;;  %v2272_v33 = vsel %vm709_vm1, %v2265_v24, 0  ;;  %v1854_v6 = vsub.f32 %v7854_v49, %v1853_v61 }
 0x2ae   :  { %6411 = vmatmul.mubr.f32.vlgmr.msra.gmra.mrb[0].mxu1 %v801_v12  ;;  %6975 = vmatprep.subr.bf16.mxu1 %v6974_v17  ;;  %v2275_v36 = vand.u32 4294901760, %v2270_v28  ;;  %v2278_v37 = vand.u32 4294901760, %v2272_v33 }
 0x2af   :  { %6417 = vmatprep.mubr.f32.mxu1 %v7745_v14  ;;  %6977 = vmatpush3.bf16.xpose.msra.mxu1 %v6974_v17  ;;  %v1855_v17 = vand.u32 4294901760, %v1854_v6 }
 0x2b0   :  { %6979 = vmatprep.subr.bf16.mxu1 %v6978_v19  ;;  %v2259_v35 = vpop.permute.xlu1 %2258  ;;  %v7835_v38 = vsub.f32 %v2270_v28, %v2275_v36  ;;  %v2261_v42 = vpop.permute.xlu0 %2260 }
 0x2b1   :  { %v2266_v39 = vsel %vm709_vm1, %v2259_v35, 0  ;;  %v27_v35 = vld [vmem:[%s8220_s1 + $0x20] sm:$0xff] }
 0x2b2   :  { %6460 = vmatmul.mubr.f32.vlgmr.msra.gmra.mrb[4].mxu0 %v7773_v1  ;;  %v7833_v32 = vand.u32 4294901760, %v2266_v39  ;;  %v2364_v47 = vand.u32 4294901760, %v7835_v38 }
 0x2b3   :  { %7005 = vmatpush3.bf16.xpose.msra.mxu0 %v7002_v8  ;;  %6466 = vmatprep.mubr.f32.mxu0 %v7787_v25  ;;  %v7837_v25 = vsub.f32 %v2272_v33, %v2278_v37  ;;  %v1834_v8 = vsub.f32 %v1750_v51, %v7884_v63  ;;  %v28_v33 = vld [vmem:[%s8220_s1 + $0x28] sm:$0xff] }
 0x2b4   :  { %7007 = vmatprep.subr.bf16.mxu0 %v7764_v31  ;;  %v2365_v59 = vsub.f32 %v7835_v38, %v2364_v47 }
 0x2b5   :  { %v7050_v22 = vpack.c.bf16 %v7837_v25, %v7835_v38 }
 0x2b6   :  { %6418 = vmatmul.mubr.f32.vlgmr.msra.gmra.mrb[0].mxu1 %v7761_v29  ;;  %v2366_v4 = vand.u32 4294901760, %v2365_v59 }
 0x2b7   :  { %6981 = vmatpush3.bf16.xpose.msra.mxu1 %v6978_v19  ;;  %6424 = vmatprep.mubr.f32.mxu1 %v7748_v16  ;;  %v7845_v16 = vsub.f32 %v2266_v39, %v7833_v32 }
 0x2b8   :  { %6983 = vmatprep.subr.bf16.mxu1 %v7800_v57 }
 0x2b9   :  { %v2343_v54 = vand.u32 4294901760, %v7845_v16 }
 0x2ba   :  { %6467 = vmatmul.mubr.f32.vlgmr.msra.gmra.mrb[4].mxu0 %v7790_v27  ;;  %v2371_v27 = vand.u32 4294901760, %v7837_v25 }
 0x2bb   :  { %7009 = vmatpush3.bf16.xpose.msra.mxu0 %v7764_v31  ;;  %6473 = vmatprep.mubr.f32.mxu0 %v1307_v15  ;;  %v7848_v15 = vand.u32 4294901760, %v1748_v45  ;;  %v2344_v2 = vsub.f32 %v7845_v16, %v2343_v54 }
 0x2bc   :  { %7011 = vmatprep.subr.bf16.mxu0 %v7010_v26 }
 0x2bd   :  { %v7865_v56 = vsub.f32 %v1748_v45, %v7848_v15  ;;  %v2345_v9 = vand.u32 4294901760, %v2344_v2 }
 0x2be   :  { %6425 = vmatmul.mubr.f32.vlgmr.msra.gmra.mrb[0].mxu1 %v7781_v40  ;;  %v7870_v40 = vpack.c.bf16 %v2278_v37, %v2275_v36 }
 0x2bf   :  { %6985 = vmatpush3.bf16.xpose.msra.mxu1 %v7800_v57  ;;  %6431 = vmatprep.mubr.f32.mxu1 %v789_v11  ;;  %v2268_v11 = vsel %vm709_vm1, %v2261_v42, 0  ;;  %v1825_v3 = vand.u32 4294901760, %v7865_v56 }
 0x2c0   :  { %6987 = vmatprep.subr.bf16.mxu1 %v6986_v41  ;;  %v7858_v50 = vand.u32 4294901760, %v2268_v11 }
 0x2c1   :  { %v1826_v13 = vsub.f32 %v7865_v56, %v1825_v3 }
 0x2c2   :  { %6474 = vmatmul.mubr.f32.vlgmr.msra.gmra.mrb[4].mxu0 %v1317_v46  ;;  %v7852_v46 = vsub.f32 %v1752_v23, %v1757_v34  ;;  %v7881_v62 = vsub.f32 %v2268_v11, %v7858_v50 }
 0x2c3   :  { %7013 = vmatpush3.bf16.xpose.msra.mxu0 %v7010_v26  ;;  %6480 = vmatprep.mubr.f32.mxu0 %v7771_v0  ;;  %v7058_v26 = vpack.c.bf16 %v2371_v27, %v2364_v47 }
 0x2c4   :  { %7015 = vmatprep.subr.bf16.mxu0 %v7764_v31  ;;  %v1846_v60 = vand.u32 4294901760, %v7852_v46  ;;  %v2353_v7 = vand.u32 4294901760, %v7881_v62 }
 0x2c6   :  { %6432 = vmatmul.mubr.f32.vlgmr.msra.gmra.mrb[0].mxu1 %v799_v52  ;;  %v2372_v52 = vsub.f32 %v7837_v25, %v2371_v27  ;;  %v2354_v18 = vsub.f32 %v7881_v62, %v2353_v7  ;;  %v7034_v28 = vpack.c.bf16 %v1853_v61, %v1846_v60 }
 0x2c7   :  { %6989 = vmatpush3.bf16.xpose.msra.mxu1 %v6986_v41  ;;  %6438 = vmatprep.mubr.f32.mxu1 %v7745_v14 }
 0x2c8   :  { %6991 = vmatprep.subr.bf16.mxu1 %v7800_v57  ;;  %v2373_v5 = vand.u32 4294901760, %v2372_v52  ;;  %v2355_v20 = vand.u32 4294901760, %v2354_v18 }
 0x2ca   :  { %6481 = vmatmul.mubr.f32.vlgmr.msra.gmra.mrb[4].mxu0 %v7773_v1  ;;  %v7046_v10 = vpack.c.bf16 %v2373_v5, %v2366_v4 }
 0x2cb   :  { %7017 = vmatpush3.bf16.xpose.msra.mxu0 %v7764_v31  ;;  %6487 = vmatprep.mubr.f32.mxu0 %v7771_v0  ;;  %v1847_v31 = vsub.f32 %v7852_v46, %v1846_v60  ;;  %v7893_v0 = vpack.c.bf16 %v1760_v44, %v1757_v34 }
 0x2cc   :  { %7043 = vmatprep.subr.bf16.mxu0 %v7870_v40 }
 0x2cd   :  { %v1848_v12 = vand.u32 4294901760, %v1847_v31 }
 0x2ce   :  { %6439 = vmatmul.mubr.f32.vlgmr.msra.gmra.mrb[0].mxu1 %v7761_v29 }
 0x2cf   :  { %6993 = vmatpush3.bf16.xpose.msra.mxu1 %v7800_v57  ;;  %6445 = vmatprep.mubr.f32.mxu1 %v7745_v14  ;;  %v1835_v57 = vand.u32 4294901760, %v1834_v8  ;;  %v1827_v14 = vand.u32 4294901760, %v1826_v13  ;;  %v7022_v19 = vpack.c.bf16 %v1855_v17, %v1848_v12 }
 0x2d0   :  { %7019 = vmatprep.subr.bf16.mxu1 %v7893_v0 }
 0x2d2   :  { %6488 = vmatmul.mubr.f32.vlgmr.msra.gmra.mrb[4].mxu0 %v7773_v1  ;;  %v1836_v1 = vsub.f32 %v1834_v8, %v1835_v57 }
 0x2d3   :  { %7045 = vmatpush3.bf16.xpose.msra.mxu0 %v7870_v40  ;;  %6536 = vmatprep.mubr.f32.mxu0 %v2345_v9 }
 0x2d4   :  { %7047 = vmatprep.subr.bf16.mxu0 %v7046_v10  ;;  %v1837_v24 = vand.u32 4294901760, %v1836_v1 }
 0x2d6   :  { %6446 = vmatmul.mubr.f32.vlgmr.msra.gmra.mrb[0].mxu1 %v7761_v29  ;;  %v7026_v29 = vpack.c.bf16 %v7854_v49, %v7852_v46 }
 0x2d7   :  { %7021 = vmatpush3.bf16.xpose.msra.mxu1 %v7893_v0  ;;  %6494 = vmatprep.mubr.f32.mxu1 %v1827_v14 }
 0x2d8   :  { %7023 = vmatprep.subr.bf16.mxu1 %v7022_v19 }
 0x2da   :  { %6537 = vmatmul.mubr.f32.vlgmr.msra.gmra.mrb[6].mxu0 %v2355_v20 }
 0x2db   :  { %7049 = vmatpush3.bf16.xpose.msra.mxu0 %v7046_v10  ;;  %6543 = vmatprep.mubr.f32.mxu0 %v7833_v32 }
 0x2dc   :  { %7051 = vmatprep.subr.bf16.mxu0 %v7050_v22 }
 0x2de   :  { %6495 = vmatmul.mubr.f32.vlgmr.msra.gmra.mrb[2].mxu1 %v1837_v24 }
 0x2df   :  { %7025 = vmatpush3.bf16.xpose.msra.mxu1 %v7022_v19  ;;  %6501 = vmatprep.mubr.f32.mxu1 %v7848_v15 }
 0x2e0   :  { %7027 = vmatprep.subr.bf16.mxu1 %v7026_v29 }
 0x2e2   :  { %6544 = vmatmul.mubr.f32.vlgmr.msra.gmra.mrb[6].mxu0 %v7858_v50 }
 0x2e3   :  { %7053 = vmatpush3.bf16.xpose.msra.mxu0 %v7050_v22  ;;  %6550 = vmatprep.mubr.f32.mxu0 %v7845_v16 }
 0x2e4   :  { %7055 = vmatprep.subr.bf16.mxu0 %v7870_v40 }
 0x2e6   :  { %6502 = vmatmul.mubr.f32.vlgmr.msra.gmra.mrb[2].mxu1 %v7884_v63 }
 0x2e7   :  { %7029 = vmatpush3.bf16.xpose.msra.mxu1 %v7026_v29  ;;  %6508 = vmatprep.mubr.f32.mxu1 %v7865_v56 }
 0x2e8   :  { %7031 = vmatprep.subr.bf16.mxu1 %v7893_v0 }
 0x2ea   :  { %6551 = vmatmul.mubr.f32.vlgmr.msra.gmra.mrb[6].mxu0 %v7881_v62 }
 0x2eb   :  { %7057 = vmatpush3.bf16.xpose.msra.mxu0 %v7870_v40  ;;  %6557 = vmatprep.mubr.f32.mxu0 %v2343_v54 }
 0x2ec   :  { %7059 = vmatprep.subr.bf16.mxu0 %v7058_v26 }
 0x2ee   :  { %6509 = vmatmul.mubr.f32.vlgmr.msra.gmra.mrb[2].mxu1 %v1834_v8 }
 0x2ef   :  { %7033 = vmatpush3.bf16.xpose.msra.mxu1 %v7893_v0  ;;  %6515 = vmatprep.mubr.f32.mxu1 %v1825_v3 }
 0x2f0   :  { %7035 = vmatprep.subr.bf16.mxu1 %v7034_v28 }
 0x2f2   :  { %6558 = vmatmul.mubr.f32.vlgmr.msra.gmra.mrb[6].mxu0 %v2353_v7 }
 0x2f3   :  { %7061 = vmatpush3.bf16.xpose.msra.mxu0 %v7058_v26  ;;  %6564 = vmatprep.mubr.f32.mxu0 %v7833_v32 }
 0x2f4   :  { %7063 = vmatprep.subr.bf16.mxu0 %v7870_v40 }
 0x2f6   :  { %6516 = vmatmul.mubr.f32.vlgmr.msra.gmra.mrb[2].mxu1 %v1835_v57 }
 0x2f7   :  { %7037 = vmatpush3.bf16.xpose.msra.mxu1 %v7034_v28  ;;  %6522 = vmatprep.mubr.f32.mxu1 %v7848_v15 }
 0x2f8   :  { %7039 = vmatprep.subr.bf16.mxu1 %v7893_v0 }
 0x2fa   :  { %6565 = vmatmul.mubr.f32.vlgmr.msra.gmra.mrb[6].mxu0 %v7858_v50 }
 0x2fb   :  { %7065 = vmatpush3.bf16.xpose.msra.mxu0 %v7870_v40  ;;  %6571 = vmatprep.mubr.f32.mxu0 %v7833_v32 }
 0x2fe   :  { %6523 = vmatmul.mubr.f32.vlgmr.msra.gmra.mrb[2].mxu1 %v7884_v63 }
 0x2ff   :  { %7041 = vmatpush3.bf16.xpose.msra.mxu1 %v7893_v0  ;;  %6529 = vmatprep.mubr.f32.mxu1 %v7848_v15 }
 0x302   :  { %6572 = vmatmul.mubr.f32.vlgmr.msra.gmra.mrb[6].mxu0 %v7858_v50 }
 0x306   :  { %6530 = vmatmul.mubr.f32.vlgmr.msra.gmra.mrb[2].mxu1 %v7884_v63 }
 0x3a5   :  { %v6489_v36 = vpop.f32.mrb[4].mxu0 }
 0x3a6   :  { %v7308_v37 = vadd.f32 %v6489_v36, %v28_v33  ;;  %v1730_v39 = vpop.f32.mrb[5].mxu0 }
 0x3a7   :  { %v7309_v41 = vadd.f32 %v1730_v39, %v27_v35 }
 0x3a8   :  { %v2786_v23 = vsel %vm2776_vm2, %v7308_v37, -inf }
 0x3a9   :  { %2787 = vmax.xlane.f32.xlu0 %v2786_v23  ;;  %v2783_v30 = vsel %vm2776_vm2, %v7309_v41, -inf  ;;  %v6447_v32 = vpop.f32.mrb[0].mxu1 }
 0x3aa   :  { %2784 = vmax.xlane.f32.xlu1 %v2783_v30  ;;  %v7306_v38 = vadd.f32 %v6447_v32, %v28_v33  ;;  %v1212_v25 = vpop.f32.mrb[1].mxu1 }
 0x3ab   :  { %v7307_v42 = vadd.f32 %v1212_v25, %v27_v35 }
 0x3ac   :  { %v2780_v34 = vsel %vm2776_vm2, %v7306_v38, -inf }
 0x3ad   :  { %v2777_v44 = vsel %vm2776_vm2, %v7307_v42, -inf }
 0x3ae   :  { %2781 = vmax.xlane.f32.xlu1 %v2780_v34  ;;  %2778 = vmax.xlane.f32.xlu0 %v2777_v44 }
 0x3d5   :  { %v6573_v45 = vpop.f32.mrb[6].mxu0 }
 0x3d6   :  { %v7957_v16 = vadd.f32 %v6573_v45, %v28_v33  ;;  %v2766_v11 = vpop.f32.mrb[7].mxu0 }
 0x3d7   :  { %v7959_v15 = vadd.f32 %v2766_v11, %v27_v35 }
 0x3d8   :  { %v2798_v19 = vsel %vm2776_vm2, %v7957_v16, -inf }
 0x3d9   :  { %v6531_v47 = vpop.f32.mrb[2].mxu1  ;;  %v2795_v1 = vsel %vm2776_vm2, %v7959_v15, -inf }
 0x3da   :  { %v7310_v27 = vadd.f32 %v6531_v47, %v28_v33  ;;  %v2248_v46 = vpop.f32.mrb[3].mxu1 }
 0x3db   :  { %v7311_v49 = vadd.f32 %v2248_v46, %v27_v35 }
 0x3dc   :  { %v2792_v50 = vsel %vm2776_vm2, %v7310_v27, -inf }
 0x3dd   :  { %2793 = vmax.xlane.f32.xlu1 %v2792_v50  ;;  %v2789_v51 = vsel %vm2776_vm2, %v7311_v49, -inf }
 0x3de   :  { %2790 = vmax.xlane.f32.xlu0 %v2789_v51 }
 0x436   :  { %v2788_v54 = vpop.xlane.xlu0 %2787 }
 0x437   :  { %v2804_v56 = vsub.f32 %v7308_v37, %v2788_v54  ;;  %v2785_v59 = vpop.xlane.xlu1 %2784 }
 0x438   :  { %v2803_v40 = vsub.f32 %v7309_v41, %v2785_v59 }
 0x439   :  { %v2815_v52 = vmul.f32 1.442695, %v2804_v56 }
 0x43a   :  { %v2813_v60 = vmul.f32 1.442695, %v2803_v40 }
 0x43b   :  { %7457 = vpow2.f32 %v2815_v52  ;;  %v2779_v3 = vpop.xlane.xlu0 %2778  ;;  %v2782_v4 = vpop.xlane.xlu1 %2781 }
 0x43c   :  { %7459 = vpow2.f32 %v2813_v60  ;;  %v2801_v5 = vsub.f32 %v7307_v42, %v2779_v3  ;;  %v2802_v31 = vsub.f32 %v7306_v38, %v2782_v4 }
 0x43e   :  { %v2809_v0 = vmul.f32 1.442695, %v2801_v5  ;;  %v2811_v6 = vmul.f32 1.442695, %v2802_v31 }
 0x440   :  { %7461 = vpow2.f32 %v2809_v0 }
 0x441   :  { %7463 = vpow2.f32 %v2811_v6 }
 0x445   :  { %v7458_v61 = vpop.eup %7457 }
 0x446   :  { %v7460_v62 = vpop.eup %7459  ;;  %v2834_v63 = vsel %vm2776_vm2, %v7458_v61, 0.0 }
 0x447   :  { %2835 = vadd.xlane.f32.xlu1 %v2834_v63  ;;  %v2831_v2 = vsel %vm2776_vm2, %v7460_v62, 0.0 }
 0x448   :  { %2832 = vadd.xlane.f32.xlu0 %v2831_v2 }
 0x44a   :  { %v7969_v17 = vpop.eup %7461 }
 0x44b   :  { %v7971_v18 = vpop.eup %7463  ;;  %v2825_v57 = vsel %vm2776_vm2, %v7969_v17, 0.0 }
 0x44c   :  { %v2828_v14 = vsel %vm2776_vm2, %v7971_v18, 0.0 }
 0x458   :  { %2869 = vrot.lane.b32.xlu1 %v7727_v43, %s7528_s14 }
 0x45e   :  { %2867 = vrot.lane.b32.xlu0 %v7722_v21, %s7528_s14 }
 0x46a   :  { %v2794_v7 = vpop.xlane.xlu1 %2793 }
 0x46b   :  { %v2791_v8 = vpop.xlane.xlu0 %2790  ;;  %v2806_v9 = vsub.f32 %v7310_v27, %v2794_v7 }
 0x46c   :  { %v2805_v10 = vsub.f32 %v7311_v49, %v2791_v8 }
 0x46d   :  { %v2819_v13 = vmul.f32 1.442695, %v2806_v9 }
 0x46e   :  { %v2817_v12 = vmul.f32 1.442695, %v2805_v10 }
 0x46f   :  { %7465 = vpow2.f32 %v2819_v13 }
 0x470   :  { %7467 = vpow2.f32 %v2817_v12 }
 0x479   :  { %v7979_v20 = vpop.eup %7465 }
 0x47a   :  { %v7983_v22 = vpop.eup %7467  ;;  %v2840_v24 = vsel %vm2776_vm2, %v7979_v20, 0.0 }
 0x47b   :  { %v2837_v29 = vsel %vm2776_vm2, %v7983_v22, 0.0 }
 0x47c   :  { %2826 = vadd.xlane.f32.xlu1 %v2825_v57 }
 0x47d   :  { %2829 = vadd.xlane.f32.xlu0 %v2828_v14 }
 0x480   :  { %2799 = vmax.xlane.f32.xlu1 %v2798_v19 }
 0x481   :  { %2796 = vmax.xlane.f32.xlu0 %v2795_v1 }
 0x484   :  { %2841 = vadd.xlane.f32.xlu1 %v2840_v24 }
 0x485   :  { %2838 = vadd.xlane.f32.xlu0 %v2837_v29 }
 0x495   :  { %3891 = vrot.lane.b32.xlu1 %v7727_v43, %s7529_s15 }
 0x49b   :  { %3889 = vrot.lane.b32.xlu0 %v7722_v21, %s7529_s15 }
 0x4d4   :  { %v2836_v26 = vpop.xlane.xlu1 %2835 }
 0x4d5   :  { %7469 = vrcp.f32 %v2836_v26  ;;  %v2833_v28 = vpop.xlane.xlu0 %2832 }
 0x4d6   :  { %7471 = vrcp.f32 %v2833_v28 }
 0x4d8   :  { %v2870_v33 = vpop.permute.xlu1 %2869 }
 0x4d9   :  { %v2883_v35 = vand.u32 4294901760, %v2870_v33  ;;  %v2868_v36 = vpop.permute.xlu0 %2867 }
 0x4da   :  { %v2880_v37 = vand.u32 4294901760, %v2868_v36 }
 0x4db   :  { %v2975_v39 = vsub.f32 %v2870_v33, %v2883_v35 }
 0x4dc   :  { %v7066_v41 = vpack.c.bf16 %v2883_v35, %v2880_v37  ;;  %v2968_v23 = vsub.f32 %v2868_v36, %v2880_v37 }
 0x4dd   :  { %v2976_v30 = vand.u32 4294901760, %v2975_v39 }
 0x4de   :  { %v2969_v32 = vand.u32 4294901760, %v2968_v23  ;;  %7067 = vmatprep.subr.bf16.mxu1 %v7066_v41 }
 0x4df   :  { %v7470_v38 = vpop.eup %7469  ;;  %v2977_v25 = vsub.f32 %v2975_v39, %v2976_v30  ;;  %7069 = vmatpush3.bf16.msra.mxu1 %v7066_v41 }
 0x4e0   :  { %v7472_v42 = vpop.eup %7471  ;;  %v2860_v34 = vmul.f32 %v7470_v38, %v7458_v61  ;;  %v2970_v44 = vsub.f32 %v2968_v23, %v2969_v32  ;;  %v7082_v2 = vpack.c.bf16 %v2976_v30, %v2969_v32 }
 0x4e1   :  { %v2859_v45 = vmul.f32 %v7472_v42, %v7460_v62  ;;  %v2978_v11 = vand.u32 4294901760, %v2977_v25  ;;  %v7074_v62 = vpack.c.bf16 %v2975_v39, %v2968_v23 }
 0x4e2   :  { %v2971_v47 = vand.u32 4294901760, %v2970_v44  ;;  %v2877_v27 = vsel %vm2776_vm2, %v2860_v34, 0 }
 0x4e3   :  { %v2874_v46 = vsel %vm2776_vm2, %v2859_v45, 0  ;;  %v2956_v49 = vand.u32 4294901760, %v2877_v27 }
 0x4e4   :  { %v7070_v50 = vpack.c.bf16 %v2978_v11, %v2971_v47  ;;  %v2946_v51 = vand.u32 4294901760, %v2874_v46 }
 0x4e5   :  { %v2957_v54 = vsub.f32 %v2877_v27, %v2956_v49 }
 0x4e6   :  { %7071 = vmatprep.subr.bf16.mxu1 %v7070_v50  ;;  %v2947_v56 = vsub.f32 %v2874_v46, %v2946_v51 }
 0x4e7   :  { %v2958_v59 = vand.u32 4294901760, %v2957_v54 }
 0x4e8   :  { %v2948_v40 = vand.u32 4294901760, %v2947_v56 }
 0x4e9   :  { %v2959_v52 = vsub.f32 %v2957_v54, %v2958_v59 }
 0x4ea   :  { %v2949_v60 = vsub.f32 %v2947_v56, %v2948_v40 }
 0x4eb   :  { %v2960_v61 = vand.u32 4294901760, %v2959_v52 }
 0x4ec   :  { %v2950_v63 = vand.u32 4294901760, %v2949_v60 }
 0x4ee   :  { %6578 = vmatprep.mubr.f32.mxu1 %v2950_v63 }
 0x4ef   :  { %6579 = vmatmul.mubr.f32.vlgmr.msra.gmra.mrb[4].mxu1 %v2960_v61 }
 0x4f0   :  { %7073 = vmatpush3.bf16.msra.mxu1 %v7070_v50  ;;  %6585 = vmatprep.mubr.f32.mxu1 %v2946_v51 }
 0x4f1   :  { %7075 = vmatprep.subr.bf16.mxu1 %v7074_v62 }
 0x4f7   :  { %6586 = vmatmul.mubr.f32.vlgmr.msra.gmra.mrb[4].mxu1 %v2956_v49 }
 0x4f8   :  { %7077 = vmatpush3.bf16.msra.mxu1 %v7074_v62  ;;  %6592 = vmatprep.mubr.f32.mxu1 %v2947_v56 }
 0x4f9   :  { %7079 = vmatprep.subr.bf16.mxu1 %v7066_v41 }
 0x4ff   :  { %6593 = vmatmul.mubr.f32.vlgmr.msra.gmra.mrb[4].mxu1 %v2957_v54 }
 0x500   :  { %7081 = vmatpush3.bf16.msra.mxu1 %v7066_v41  ;;  %6599 = vmatprep.mubr.f32.mxu1 %v2948_v40 }
 0x501   :  { %7083 = vmatprep.subr.bf16.mxu1 %v7082_v2 }
 0x507   :  { %6600 = vmatmul.mubr.f32.vlgmr.msra.gmra.mrb[4].mxu1 %v2958_v59 }
 0x508   :  { %7085 = vmatpush3.bf16.msra.mxu1 %v7082_v2  ;;  %6606 = vmatprep.mubr.f32.mxu1 %v2946_v51 }
 0x509   :  { %7087 = vmatprep.subr.bf16.mxu1 %v7066_v41  ;;  %v2827_v3 = vpop.xlane.xlu1 %2826 }
 0x50a   :  { %7473 = vrcp.f32 %v2827_v3  ;;  %v2830_v4 = vpop.xlane.xlu0 %2829 }
 0x50b   :  { %7475 = vrcp.f32 %v2830_v4 }
 0x50d   :  { %v2800_v5 = vpop.xlane.xlu1 %2799 }
 0x50e   :  { %v2808_v31 = vsub.f32 %v7957_v16, %v2800_v5  ;;  %v2797_v0 = vpop.xlane.xlu0 %2796 }
 0x50f   :  { %v2807_v6 = vsub.f32 %v7959_v15, %v2797_v0  ;;  %6607 = vmatmul.mubr.f32.vlgmr.msra.gmra.mrb[4].mxu1 %v2956_v49 }
 0x510   :  { %v2823_v7 = vmul.f32 1.442695, %v2808_v31  ;;  %7089 = vmatpush3.bf16.msra.mxu1 %v7066_v41  ;;  %6613 = vmatprep.mubr.f32.mxu1 %v2946_v51 }
 0x511   :  { %v2821_v8 = vmul.f32 1.442695, %v2807_v6  ;;  %7091 = vmatprep.subr.bf16.mxu1 %v7732_v48  ;;  %v2842_v41 = vpop.xlane.xlu1 %2841 }
 0x512   :  { %7477 = vpow2.f32 %v2823_v7  ;;  %v2839_v39 = vpop.xlane.xlu0 %2838 }
 0x513   :  { %7479 = vpow2.f32 %v2821_v8 }
 0x514   :  { %v7474_v9 = vpop.eup %7473  ;;  %7481 = vrcp.f32 %v2839_v39 }
 0x515   :  { %v7476_v10 = vpop.eup %7475  ;;  %v2857_v13 = vmul.f32 %v7474_v9, %v7969_v17  ;;  %7483 = vrcp.f32 %v2842_v41  ;;  %v3892_v30 = vpop.permute.xlu1 %3891 }
 0x516   :  { %v2858_v12 = vmul.f32 %v7476_v10, %v7971_v18  ;;  %v3890_v32 = vpop.permute.xlu0 %3889  ;;  %v3905_v38 = vand.u32 4294901760, %v3892_v30 }
 0x517   :  { %6614 = vmatmul.mubr.f32.vlgmr.msra.gmra.mrb[4].mxu1 %v2956_v49  ;;  %v3382_v16 = vsel %vm2776_vm2, %v2857_v13, 0  ;;  %v3902_v25 = vand.u32 4294901760, %v3890_v32 }
 0x518   :  { %7093 = vmatpush3.bf16.msra.mxu1 %v7732_v48  ;;  %v8002_v15 = vand.u32 4294901760, %v3382_v16  ;;  %v3385_v57 = vsel %vm2776_vm2, %v2858_v12, 0 }
 0x519   :  { %7095 = vmatprep.subr.bf16.mxu1 %v7740_v58  ;;  %v8006_v14 = vand.u32 4294901760, %v3385_v57  ;;  %v3990_v44 = vsub.f32 %v3890_v32, %v3902_v25  ;;  %v7114_v50 = vpack.c.bf16 %v3905_v38, %v3902_v25  ;;  %v7501_v32 = vld [vmem:[%s8219_s0 + $0x8] sm:$0xff]  ;;  %v7502_v25 = vld [vmem:[%s8219_s0] sm:$0xff] }
 0x51a   :  { %v3455_v19 = vsub.f32 %v3382_v16, %v8002_v15 }
 0x51b   :  { %v3465_v1 = vsub.f32 %v3385_v57, %v8006_v14  ;;  %v3991_v47 = vand.u32 4294901760, %v3990_v44 }
 0x51c   :  { %v8010_v17 = vpop.eup %7477  ;;  %v3456_v18 = vand.u32 4294901760, %v3455_v19 }
 0x51d   :  { %v8012_v24 = vpop.eup %7479  ;;  %v2846_v29 = vsel %vm2776_vm2, %v8010_v17, 0.0  ;;  %v3466_v26 = vand.u32 4294901760, %v3465_v1 }
 0x51e   :  { %2847 = vadd.xlane.f32.xlu0 %v2846_v29  ;;  %v2843_v28 = vsel %vm2776_vm2, %v8012_v24, 0.0  ;;  %v3457_v33 = vsub.f32 %v3455_v19, %v3456_v18  ;;  %v7482_v23 = vpop.eup %7481 }
 0x51f   :  { %2844 = vadd.xlane.f32.xlu1 %v2843_v28  ;;  %v3467_v35 = vsub.f32 %v3465_v1, %v3466_v26 }
 0x520   :  { %v3458_v36 = vand.u32 4294901760, %v3457_v33 }
 0x521   :  { %v3468_v37 = vand.u32 4294901760, %v3467_v35 }
 0x522   :  { %6620 = vmatprep.mubr.f32.mxu1 %v3458_v36 }
 0x523   :  { %6621 = vmatmul.mubr.f32.vlgmr.msra.gmra.mrb[4].mxu1 %v3468_v37 }
 0x524   :  { %7097 = vmatpush3.bf16.msra.mxu1 %v7740_v58  ;;  %6627 = vmatprep.mubr.f32.mxu1 %v8002_v15  ;;  %v2861_v58 = vmul.f32 %v7482_v23, %v7983_v22  ;;  %v3997_v22 = vsub.f32 %v3892_v30, %v3905_v38 }
 0x525   :  { %7099 = vmatprep.subr.bf16.mxu1 %v7735_v53 }
 0x526   :  { %v3896_v42 = vsel %vm2776_vm2, %v2861_v58, 0  ;;  %v3998_v11 = vand.u32 4294901760, %v3997_v22  ;;  %v7122_v61 = vpack.c.bf16 %v3997_v22, %v3990_v44 }
 0x527   :  { %v3968_v34 = vand.u32 4294901760, %v3896_v42 }
 0x528   :  { %v3999_v49 = vsub.f32 %v3997_v22, %v3998_v11 }
 0x52a   :  { %v4000_v56 = vand.u32 4294901760, %v3999_v49 }
 0x52b   :  { %6628 = vmatmul.mubr.f32.vlgmr.msra.gmra.mrb[4].mxu1 %v8006_v14 }
 0x52c   :  { %7101 = vmatpush3.bf16.msra.mxu1 %v7735_v53  ;;  %6634 = vmatprep.mubr.f32.mxu1 %v3455_v19  ;;  %v7484_v53 = vpop.eup %7483 }
 0x52d   :  { %7103 = vmatprep.subr.bf16.mxu1 %v7732_v48 }
 0x530   :  { %4407 = vrot.lane.b32.xlu1 %v7727_v43, %s7530_s20  ;;  %v2862_v43 = vmul.f32 %v7484_v53, %v7979_v20  ;;  %v3992_v20 = vsub.f32 %v3990_v44, %v3991_v47 }
 0x532   :  { %v3899_v45 = vsel %vm2776_vm2, %v2862_v43, 0  ;;  %v3993_v54 = vand.u32 4294901760, %v3992_v20 }
 0x533   :  { %6635 = vmatmul.mubr.f32.vlgmr.msra.gmra.mrb[4].mxu1 %v3465_v1  ;;  %v3978_v27 = vand.u32 4294901760, %v3899_v45 }
 0x534   :  { %7105 = vmatpush3.bf16.msra.mxu1 %v7732_v48  ;;  %4405 = vrot.lane.b32.xlu0 %v7722_v21, %s7530_s20  ;;  %v3969_v21 = vsub.f32 %v3896_v42, %v3968_v34  ;;  %v7118_v52 = vpack.c.bf16 %v4000_v56, %v3993_v54 }
 0x535   :  { %6641 = vmatprep.mubr.f32.mxu1 %v3456_v18  ;;  %7107 = vmatprep.subr.bf16.mxu1 %v7738_v55 }
 0x536   :  { %v3970_v46 = vand.u32 4294901760, %v3969_v21 }
 0x538   :  { %v3971_v51 = vsub.f32 %v3969_v21, %v3970_v46 }
 0x53a   :  { %v3972_v40 = vand.u32 4294901760, %v3971_v51 }
 0x53b   :  { %6642 = vmatmul.mubr.f32.vlgmr.msra.gmra.mrb[4].mxu1 %v3466_v26 }
 0x53c   :  { %7109 = vmatpush3.bf16.msra.mxu1 %v7738_v55  ;;  %6648 = vmatprep.mubr.f32.mxu1 %v8002_v15  ;;  %v3979_v55 = vsub.f32 %v3899_v45, %v3978_v27  ;;  %v4940_v45 = vld [vmem:[%s8222_s3 + $0x8] sm:$0xff] }
 0x53d   :  { %7111 = vmatprep.subr.bf16.mxu1 %v7732_v48 }
 0x53e   :  { %v3980_v59 = vand.u32 4294901760, %v3979_v55 }
 0x540   :  { %v3981_v60 = vsub.f32 %v3979_v55, %v3980_v59 }
 0x542   :  { %v3982_v63 = vand.u32 4294901760, %v3981_v60 }
 0x543   :  { %6649 = vmatmul.mubr.f32.vlgmr.msra.gmra.mrb[4].mxu1 %v8006_v14 }
 0x544   :  { %7113 = vmatpush3.bf16.msra.mxu1 %v7732_v48  ;;  %6655 = vmatprep.mubr.f32.mxu1 %v8002_v15  ;;  %v7130_v48 = vpack.c.bf16 %v3998_v11, %v3991_v47  ;;  %v4941_v11 = vld [vmem:[%s8222_s3 + $0x10] sm:$0xff] }
 0x545   :  { %7115 = vmatprep.subr.bf16.mxu1 %v7114_v50  ;;  %v4956_v49 = vand.u32 4294901760, %v4941_v11 }
 0x547   :  { %v5054_v60 = vsub.f32 %v4941_v11, %v4956_v49  ;;  %v5505_v11 = vld [vmem:[%s8223_s4 + $0x20] sm:$0xff] }
 0x54b   :  { %6656 = vmatmul.mubr.f32.vlgmr.msra.gmra.mrb[4].mxu1 %v8006_v14 }
 0x54c   :  { %7117 = vmatpush3.bf16.msra.mxu1 %v7114_v50  ;;  %6662 = vmatprep.mubr.f32.mxu1 %v3972_v40 }
 0x54d   :  { %7119 = vmatprep.subr.bf16.mxu1 %v7118_v52 }
 0x553   :  { %6663 = vmatmul.mubr.f32.vlgmr.msra.gmra.mrb[4].mxu1 %v3982_v63 }
 0x554   :  { %7121 = vmatpush3.bf16.msra.mxu1 %v7118_v52  ;;  %6669 = vmatprep.mubr.f32.mxu1 %v3968_v34 }
 0x555   :  { %7123 = vmatprep.subr.bf16.mxu1 %v7122_v61 }
 0x55b   :  { %6670 = vmatmul.mubr.f32.vlgmr.msra.gmra.mrb[4].mxu1 %v3978_v27 }
 0x55c   :  { %7125 = vmatpush3.bf16.msra.mxu1 %v7122_v61  ;;  %6676 = vmatprep.mubr.f32.mxu1 %v3969_v21  ;;  %v4939_v21 = vld [vmem:[%s8222_s3] sm:$0xff] }
 0x55d   :  { %7127 = vmatprep.subr.bf16.mxu1 %v7114_v50  ;;  %v4950_v47 = vand.u32 4294901760, %v4939_v21 }
 0x55f   :  { %v5040_v51 = vsub.f32 %v4939_v21, %v4950_v47 }
 0x561   :  { %v5041_v56 = vand.u32 4294901760, %v5040_v51 }
 0x563   :  { %6677 = vmatmul.mubr.f32.vlgmr.msra.gmra.mrb[4].mxu1 %v3979_v55  ;;  %v5042_v40 = vsub.f32 %v5040_v51, %v5041_v56 }
 0x564   :  { %7129 = vmatpush3.bf16.msra.mxu1 %v7114_v50  ;;  %6683 = vmatprep.mubr.f32.mxu1 %v3970_v46  ;;  %v4942_v46 = vld [vmem:[%s8222_s3 + $0x18] sm:$0xff] }
 0x565   :  { %7131 = vmatprep.subr.bf16.mxu1 %v7130_v48  ;;  %v5043_v61 = vand.u32 4294901760, %v5042_v40 }
 0x56b   :  { %6684 = vmatmul.mubr.f32.vlgmr.msra.gmra.mrb[4].mxu1 %v3980_v59 }
 0x56c   :  { %7133 = vmatpush3.bf16.msra.mxu1 %v7130_v48  ;;  %6690 = vmatprep.mubr.f32.mxu1 %v3968_v34 }
 0x56d   :  { %7135 = vmatprep.subr.bf16.mxu1 %v7114_v50 }
 0x573   :  { %6691 = vmatmul.mubr.f32.vlgmr.msra.gmra.mrb[4].mxu1 %v3978_v27 }
 0x574   :  { %7137 = vmatpush3.bf16.msra.mxu1 %v7114_v50  ;;  %6697 = vmatprep.mubr.f32.mxu1 %v3968_v34  ;;  %v4959_v50 = vand.u32 4294901760, %v4942_v46 }
 0x576   :  { %v8075_v55 = vpack.c.bf16 %v4959_v50, %v4956_v49  ;;  %v5061_v63 = vsub.f32 %v4942_v46, %v4959_v50  ;;  %v5507_v50 = vld [vmem:[%s8223_s4 + $0x30] sm:$0xff] }
 0x57b   :  { %6698 = vmatmul.mubr.f32.vlgmr.msra.gmra.mrb[4].mxu1 %v3978_v27  ;;  %v4953_v27 = vand.u32 4294901760, %v4940_v45 }
 0x57d   :  { %v8073_v20 = vpack.c.bf16 %v4953_v27, %v4950_v47  ;;  %v5047_v54 = vsub.f32 %v4940_v45, %v4953_v27  ;;  %v5506_v47 = vld [vmem:[%s8223_s4 + $0x28] sm:$0xff]  ;;  %v5529_v27 = vand.u32 4294901760, %v5505_v11 }
 0x57e   :  { %v5532_v46 = vand.u32 4294901760, %v5506_v47 }
 0x57f   :  { %7163 = vmatprep.subr.bf16.mxu0 %v8073_v20  ;;  %v5048_v59 = vand.u32 4294901760, %v5047_v54 }
 0x580   :  { %7165 = vmatpush3.bf16.msra.mxu0 %v8073_v20  ;;  %v8133_v49 = vpack.c.bf16 %v5532_v46, %v5529_v27 }
 0x581   :  { %7167 = vmatprep.subr.bf16.mxu0 %v8075_v55  ;;  %v5049_v52 = vsub.f32 %v5047_v54, %v5048_v59 }
 0x583   :  { %v5050_v48 = vand.u32 4294901760, %v5049_v52 }
 0x584   :  { %7169 = vmatpush3.bf16.msra.mxu0 %v8075_v55 }
 0x5ab   :  { %v2848_v62 = vpop.xlane.xlu0 %2847 }
 0x5ac   :  { %7485 = vrcp.f32 %v2848_v62  ;;  %v2845_v2 = vpop.xlane.xlu1 %2844  ;;  %v5055_v62 = vand.u32 4294901760, %v5054_v60 }
 0x5ad   :  { %7487 = vrcp.f32 %v2845_v2  ;;  %v5062_v2 = vand.u32 4294901760, %v5061_v63 }
 0x5af   :  { %v4406_v3 = vpop.permute.xlu0 %4405 }
 0x5b0   :  { %v4418_v4 = vand.u32 4294901760, %v4406_v3  ;;  %v4408_v5 = vpop.permute.xlu1 %4407 }
 0x5b1   :  { %v4421_v31 = vand.u32 4294901760, %v4408_v5 }
 0x5b2   :  { %v4506_v0 = vsub.f32 %v4406_v3, %v4418_v4  ;;  %v7170_v3 = vpack.c.bf16 %v5050_v48, %v5043_v61 }
 0x5b3   :  { %v7138_v6 = vpack.c.bf16 %v4421_v31, %v4418_v4  ;;  %v4513_v7 = vsub.f32 %v4408_v5, %v4421_v31  ;;  %v5056_v4 = vsub.f32 %v5054_v60, %v5055_v62  ;;  %v5063_v5 = vsub.f32 %v5061_v63, %v5062_v2 }
 0x5b4   :  { %v4507_v8 = vand.u32 4294901760, %v4506_v0  ;;  %7171 = vmatprep.subr.bf16.mxu0 %v7170_v3 }
 0x5b5   :  { %v4514_v9 = vand.u32 4294901760, %v4513_v7  ;;  %7139 = vmatprep.subr.bf16.mxu1 %v7138_v6  ;;  %v5057_v31 = vand.u32 4294901760, %v5056_v4 }
 0x5b6   :  { %v7486_v10 = vpop.eup %7485  ;;  %v4508_v13 = vsub.f32 %v4506_v0, %v4507_v8  ;;  %7141 = vmatpush3.bf16.msra.mxu1 %v7138_v6 }
 0x5b7   :  { %v7488_v12 = vpop.eup %7487  ;;  %v2864_v16 = vmul.f32 %v7486_v10, %v8010_v17  ;;  %v4515_v15 = vsub.f32 %v4513_v7, %v4514_v9  ;;  %v7154_v58 = vpack.c.bf16 %v4514_v9, %v4507_v8  ;;  %v7182_v8 = vpack.c.bf16 %v5061_v63, %v5054_v60 }
 0x5b8   :  { %v2863_v57 = vmul.f32 %v7488_v12, %v8012_v24  ;;  %v4509_v14 = vand.u32 4294901760, %v4508_v13  ;;  %v7146_v24 = vpack.c.bf16 %v4513_v7, %v4506_v0  ;;  %v5064_v0 = vand.u32 4294901760, %v5063_v5 }
 0x5b9   :  { %v4516_v19 = vand.u32 4294901760, %v4515_v15  ;;  %v4415_v1 = vsel %vm2776_vm2, %v2864_v16, 0  ;;  %v7178_v7 = vpack.c.bf16 %v5047_v54, %v5040_v51  ;;  %v7194_v9 = vpack.c.bf16 %v5048_v59, %v5041_v56 }
 0x5ba   :  { %v4412_v18 = vsel %vm2776_vm2, %v2863_v57, 0  ;;  %v4494_v29 = vand.u32 4294901760, %v4415_v1  ;;  %v7198_v10 = vpack.c.bf16 %v5062_v2, %v5055_v62  ;;  %v5639_v5 = vsub.f32 %v5505_v11, %v5529_v27 }
 0x5bb   :  { %v7142_v26 = vpack.c.bf16 %v4516_v19, %v4509_v14  ;;  %v4484_v28 = vand.u32 4294901760, %v4412_v18 }
 0x5bc   :  { %v4495_v33 = vsub.f32 %v4415_v1, %v4494_v29 }
 0x5bd   :  { %7143 = vmatprep.subr.bf16.mxu1 %v7142_v26  ;;  %v4485_v35 = vsub.f32 %v4412_v18, %v4484_v28 }
 0x5be   :  { %v4496_v36 = vand.u32 4294901760, %v4495_v33 }
 0x5bf   :  { %v4486_v37 = vand.u32 4294901760, %v4485_v35 }
 0x5c0   :  { %v4497_v39 = vsub.f32 %v4495_v33, %v4496_v36 }
 0x5c1   :  { %v4487_v41 = vsub.f32 %v4485_v35, %v4486_v37 }
 0x5c2   :  { %v4498_v23 = vand.u32 4294901760, %v4497_v39 }
 0x5c3   :  { %v4488_v17 = vand.u32 4294901760, %v4487_v41 }
 0x5c5   :  { %6704 = vmatprep.mubr.f32.mxu1 %v4488_v17 }
 0x5c6   :  { %6705 = vmatmul.mubr.f32.vlgmr.msra.gmra.mrb[4].mxu1 %v4498_v23 }
 0x5c7   :  { %7145 = vmatpush3.bf16.msra.mxu1 %v7142_v26  ;;  %6711 = vmatprep.mubr.f32.mxu1 %v4484_v28 }
 0x5c8   :  { %7147 = vmatprep.subr.bf16.mxu1 %v7146_v24 }
 0x5ce   :  { %6712 = vmatmul.mubr.f32.vlgmr.msra.gmra.mrb[4].mxu1 %v4494_v29 }
 0x5cf   :  { %7149 = vmatpush3.bf16.msra.mxu1 %v7146_v24  ;;  %6718 = vmatprep.mubr.f32.mxu1 %v4485_v35 }
 0x5d0   :  { %7151 = vmatprep.subr.bf16.mxu1 %v7138_v6 }
 0x5d6   :  { %6719 = vmatmul.mubr.f32.vlgmr.msra.gmra.mrb[4].mxu1 %v4495_v33 }
 0x5d7   :  { %7153 = vmatpush3.bf16.msra.mxu1 %v7138_v6  ;;  %6725 = vmatprep.mubr.f32.mxu1 %v4486_v37 }
 0x5d8   :  { %7155 = vmatprep.subr.bf16.mxu1 %v7154_v58 }
 0x5de   :  { %6726 = vmatmul.mubr.f32.vlgmr.msra.gmra.mrb[4].mxu1 %v4496_v36 }
 0x5df   :  { %7157 = vmatpush3.bf16.msra.mxu1 %v7154_v58  ;;  %6732 = vmatprep.mubr.f32.mxu1 %v4484_v28 }
 0x5e0   :  { %7159 = vmatprep.subr.bf16.mxu1 %v7138_v6 }
 0x5e6   :  { %6733 = vmatmul.mubr.f32.vlgmr.msra.gmra.mrb[4].mxu1 %v4494_v29 }
 0x5e7   :  { %7161 = vmatpush3.bf16.msra.mxu1 %v7138_v6  ;;  %6739 = vmatprep.mubr.f32.mxu1 %v4484_v28  ;;  %v7174_v6 = vpack.c.bf16 %v5064_v0, %v5057_v31  ;;  %v5646_v31 = vsub.f32 %v5506_v47, %v5532_v46  ;;  %v5640_v0 = vand.u32 4294901760, %v5639_v5 }
 0x5ee   :  { %6740 = vmatmul.mubr.f32.vlgmr.msra.gmra.mrb[4].mxu1 %v4494_v29 }
 0x6c1   :  { %v6741_v30 = vpop.f32.mrb[4].mxu1 }
 0x6c2   :  { %v8048_v53 = vadd.f32 %v7501_v32, %v6741_v30  ;;  %v4909_v38 = vpop.f32.mrb[5].mxu1  ;;  %v5501_v30 = vld [vmem:[%s8223_s4] sm:$0xff]  ;;  %v5502_v32 = vld [vmem:[%s8223_s4 + $0x8] sm:$0xff] }
 0x6c3   :  { %v8053_v42 = vadd.f32 %v7502_v25, %v4909_v38  ;;  %v8102_v38 = vld [vmem:[%s8223_s4 + $0x10] sm:$0xff]  ;;  %v5517_v25 = vand.u32 4294901760, %v5501_v30 }
 0x6c4   :  { %v4924_v43 = vmul.f32 %v8048_v53, %v8048_v53 }
 0x6c5   :  { %v4923_v34 = vmul.f32 %v8053_v42, %v8053_v42  ;;  %v5611_v56 = vsub.f32 %v5501_v30, %v5517_v25 }
 0x6c6   :  { %v4928_v22 = vsel %vm31_vm0, %v4924_v43, 0.0  ;;  %v5520_v43 = vand.u32 4294901760, %v5502_v32 }
 0x6c7   :  { %4929 = vadd.xlane.f32.xlu0 %v4928_v22  ;;  %v4925_v44 = vsel %vm31_vm0, %v4923_v34, 0.0  ;;  %v8107_v34 = vld [vmem:[%s8223_s4 + $0x18] sm:$0xff]  ;;  %v5523_v22 = vand.u32 4294901760, %v8102_v38  ;;  %v5612_v40 = vand.u32 4294901760, %v5611_v56 }
 0x6c8   :  { %4926 = vadd.xlane.f32.xlu1 %v4925_v44  ;;  %v5526_v44 = vand.u32 4294901760, %v8107_v34  ;;  %v8111_v21 = vpack.c.bf16 %v5520_v43, %v5517_v25  ;;  %v5618_v59 = vsub.f32 %v5502_v32, %v5520_v43 }
 0x6c9   :  { %v5613_v63 = vsub.f32 %v5611_v56, %v5612_v40  ;;  %v5625_v32 = vsub.f32 %v8102_v38, %v5523_v22 }
 0x6ca   :  { %v8117_v45 = vpack.c.bf16 %v5526_v44, %v5523_v22  ;;  %7211 = vmatprep.subr.bf16.mxu1 %v8111_v21  ;;  %v5619_v52 = vand.u32 4294901760, %v5618_v59  ;;  %v5632_v25 = vsub.f32 %v8107_v34, %v5526_v44 }
 0x6cb   :  { %7213 = vmatpush3.bf16.msra.mxu1 %v8111_v21  ;;  %v5614_v62 = vand.u32 4294901760, %v5613_v63 }
 0x6cc   :  { %7215 = vmatprep.subr.bf16.mxu1 %v8117_v45  ;;  %v8151_v60 = vpack.c.bf16 %v5619_v52, %v5612_v40  ;;  %v5620_v61 = vsub.f32 %v5618_v59, %v5619_v52 }
 0x6ce   :  { %v5621_v2 = vand.u32 4294901760, %v5620_v61 }
 0x6cf   :  { %7217 = vmatpush3.bf16.msra.mxu1 %v8117_v45 }
 0x6d0   :  { %7219 = vmatprep.subr.bf16.mxu1 %v8133_v49  ;;  %v8156_v4 = vpack.c.bf16 %v5621_v2, %v5614_v62 }
 0x6d3   :  { %7221 = vmatpush3.bf16.msra.mxu1 %v8133_v49 }
 0x754   :  { %v4930_v13 = vpop.xlane.xlu0 %4929 }
 0x755   :  { %v4932_v12 = vmul.f32 0.03125, %v4930_v13  ;;  %v4927_v16 = vpop.xlane.xlu1 %4926 }
 0x756   :  { %v4931_v15 = vmul.f32 0.03125, %v4927_v16 }
 0x757   :  { %v4934_v57 = vadd.f32 1e-06, %v4932_v12 }
 0x758   :  { %v4933_v14 = vadd.f32 1e-06, %v4931_v15 }
 0x759   :  { %7489 = vrsqrt.f32 %v4934_v57 }
 0x75a   :  { %7491 = vrsqrt.f32 %v4933_v14 }
 0x763   :  { %v7490_v19 = vpop.eup %7489 }
 0x764   :  { %v7492_v1 = vpop.eup %7491  ;;  %v4938_v18 = vmul.f32 %v7490_v19, %v8048_v53 }
 0x765   :  { %v4937_v29 = vmul.f32 %v7492_v1, %v8053_v42 }
 0x766   :  { %v4947_v26 = vsel %vm31_vm0, %v4938_v18, 0 }
 0x767   :  { %v4944_v28 = vsel %vm31_vm0, %v4937_v29, 0  ;;  %v5028_v33 = vand.u32 4294901760, %v4947_v26 }
 0x768   :  { %v5018_v35 = vand.u32 4294901760, %v4944_v28 }
 0x769   :  { %v5029_v36 = vsub.f32 %v4947_v26, %v5028_v33 }
 0x76a   :  { %v5019_v37 = vsub.f32 %v4944_v28, %v5018_v35 }
 0x76b   :  { %v5030_v39 = vand.u32 4294901760, %v5029_v36 }
 0x76c   :  { %v5020_v41 = vand.u32 4294901760, %v5019_v37 }
 0x76d   :  { %v5031_v17 = vsub.f32 %v5029_v36, %v5030_v39 }
 0x76e   :  { %v5021_v23 = vsub.f32 %v5019_v37, %v5020_v41 }
 0x76f   :  { %v5032_v58 = vand.u32 4294901760, %v5031_v17 }
 0x770   :  { %v5022_v24 = vand.u32 4294901760, %v5021_v23 }
 0x772   :  { %6750 = vmatprep.mubr.f32.mxu0 %v5022_v24 }
 0x773   :  { %6751 = vmatmul.mubr.f32.vlgmr.msra.gmra.mrb[8].mxu0 %v5032_v58 }
 0x774   :  { %7173 = vmatpush3.bf16.msra.mxu0 %v7170_v3  ;;  %6761 = vmatprep.mubr.f32.mxu0 %v5018_v35 }
 0x775   :  { %7175 = vmatprep.subr.bf16.mxu0 %v7174_v6 }
 0x778   :  { %7177 = vmatpush3.bf16.msra.mxu0 %v7174_v6  ;;  %v5647_v6 = vand.u32 4294901760, %v5646_v31 }
 0x779   :  { %7179 = vmatprep.subr.bf16.mxu0 %v7178_v7 }
 0x77a   :  { %v5648_v13 = vsub.f32 %v5646_v31, %v5647_v6 }
 0x77b   :  { %6762 = vmatmul.mubr.f32.vlgmr.msra.gmra.mrb[8].mxu0 %v5028_v33 }
 0x77c   :  { %7181 = vmatpush3.bf16.msra.mxu0 %v7178_v7  ;;  %6772 = vmatprep.mubr.f32.mxu0 %v5019_v37  ;;  %v5641_v7 = vsub.f32 %v5639_v5, %v5640_v0  ;;  %v5649_v57 = vand.u32 4294901760, %v5648_v13 }
 0x77d   :  { %7183 = vmatprep.subr.bf16.mxu0 %v7182_v8 }
 0x77e   :  { %v5642_v12 = vand.u32 4294901760, %v5641_v7 }
 0x780   :  { %7185 = vmatpush3.bf16.msra.mxu0 %v7182_v8  ;;  %v8163_v18 = vpack.c.bf16 %v5649_v57, %v5642_v12 }
 0x781   :  { %7187 = vmatprep.subr.bf16.mxu0 %v8073_v20 }
 0x783   :  { %6773 = vmatmul.mubr.f32.vlgmr.msra.gmra.mrb[8].mxu0 %v5029_v36 }
 0x784   :  { %7189 = vmatpush3.bf16.msra.mxu0 %v8073_v20  ;;  %6783 = vmatprep.mubr.f32.mxu0 %v5020_v41 }
 0x785   :  { %7191 = vmatprep.subr.bf16.mxu0 %v8075_v55 }
 0x788   :  { %7193 = vmatpush3.bf16.msra.mxu0 %v8075_v55 }
 0x789   :  { %7195 = vmatprep.subr.bf16.mxu0 %v7194_v9 }
 0x78b   :  { %6784 = vmatmul.mubr.f32.vlgmr.msra.gmra.mrb[8].mxu0 %v5030_v39 }
 0x78c   :  { %7197 = vmatpush3.bf16.msra.mxu0 %v7194_v9  ;;  %6794 = vmatprep.mubr.f32.mxu0 %v5018_v35 }
 0x78d   :  { %7199 = vmatprep.subr.bf16.mxu0 %v7198_v10 }
 0x790   :  { %7201 = vmatpush3.bf16.msra.mxu0 %v7198_v10  ;;  %v8159_v10 = vpack.c.bf16 %v5647_v6, %v5640_v0 }
 0x791   :  { %7203 = vmatprep.subr.bf16.mxu0 %v8073_v20 }
 0x793   :  { %6795 = vmatmul.mubr.f32.vlgmr.msra.gmra.mrb[8].mxu0 %v5028_v33 }
 0x794   :  { %7205 = vmatpush3.bf16.msra.mxu0 %v8073_v20  ;;  %6805 = vmatprep.mubr.f32.mxu0 %v5018_v35  ;;  %v5508_v20 = vld [vmem:[%s8223_s4 + $0x38] sm:$0xff]  ;;  %v8169_v35 = vpack.c.bf16 %v5646_v31, %v5639_v5  ;;  %s7537_s4 = smov [#allocation2]  }
 0x795   :  { %7207 = vmatprep.subr.bf16.mxu0 %v8075_v55  ;;  %v5538_v51 = vand.u32 4294901760, %v5508_v20 }
 0x797   :  { %v5660_v9 = vsub.f32 %v5508_v20, %v5538_v51  ;;  %v5626_v20 = vand.u32 4294901760, %v5625_v32 }
 0x798   :  { %7209 = vmatpush3.bf16.msra.mxu0 %v8075_v55  ;;  %v5535_v55 = vand.u32 4294901760, %v5507_v50 }
 0x799   :  { %7259 = vmatprep.subr.bf16.mxu0 %v8111_v21  ;;  %v5661_v15 = vand.u32 4294901760, %v5660_v9  ;;  %v5627_v63 = vsub.f32 %v5625_v32, %v5626_v20 }
 0x79a   :  { %v8145_v54 = vpack.c.bf16 %v5538_v51, %v5535_v55  ;;  %v5653_v8 = vsub.f32 %v5507_v50, %v5535_v55  ;;  %v5633_v55 = vand.u32 4294901760, %v5632_v25 }
 0x79b   :  { %6806 = vmatmul.mubr.f32.vlgmr.msra.gmra.mrb[8].mxu0 %v5028_v33  ;;  %v5662_v1 = vsub.f32 %v5660_v9, %v5661_v15  ;;  %v8167_v33 = vpack.c.bf16 %v5618_v59, %v5611_v56 }
 0x79c   :  { %7261 = vmatpush3.bf16.msra.mxu0 %v8111_v21  ;;  %7223 = vmatprep.subr.bf16.mxu1 %v8145_v54  ;;  %v5654_v16 = vand.u32 4294901760, %v5653_v8  ;;  %v8171_v36 = vpack.c.bf16 %v5660_v9, %v5653_v8  ;;  %v5634_v38 = vsub.f32 %v5632_v25, %v5633_v55  ;;  %v7278_v34 = vpack.c.bf16 %v5633_v55, %v5626_v20 }
 0x79d   :  { %7263 = vmatprep.subr.bf16.mxu0 %v8117_v45  ;;  %7225 = vmatpush3.bf16.msra.mxu1 %v8145_v54  ;;  %v5663_v26 = vand.u32 4294901760, %v5662_v1 }
 0x79e   :  { %7227 = vmatprep.subr.bf16.mxu1 %v8156_v4  ;;  %v8161_v14 = vpack.c.bf16 %v5661_v15, %v5654_v16  ;;  %v5655_v19 = vsub.f32 %v5653_v8, %v5654_v16  ;;  %v5635_v2 = vand.u32 4294901760, %v5634_v38 }
 0x7a0   :  { %7265 = vmatpush3.bf16.msra.mxu0 %v8117_v45  ;;  %v5656_v29 = vand.u32 4294901760, %v5655_v19 }
 0x7a1   :  { %7267 = vmatprep.subr.bf16.mxu0 %v8133_v49 }
 0x7a2   :  { %v8165_v28 = vpack.c.bf16 %v5663_v26, %v5656_v29 }
 0x7a4   :  { %7269 = vmatpush3.bf16.msra.mxu0 %v8133_v49 }
 0x7a5   :  { %7271 = vmatprep.subr.bf16.mxu0 %v8145_v54 }
 0x7a8   :  { %7273 = vmatpush3.bf16.msra.mxu0 %v8145_v54 }
 0x7a9   :  { %7275 = vmatprep.subr.bf16.mxu0 %v8151_v60 }
 0x86e   :  { %v6807_v48 = vpop.f32.mrb[8].mxu0 }
 0x86f   :  { %5495 = vrot.lane.b32.xlu1 %v6807_v48, %s7529_s15  ;;  %v5467_v3 = vpop.f32.mrb[9].mxu0  ;;  %v6117_v37 = vmul.f32 -1.442695, %v6807_v48 }
 0x870   :  { %5493 = vrot.lane.b32.xlu0 %v5467_v3, %s7529_s15  ;;  %v6116_v39 = vmul.f32 -1.442695, %v5467_v3  ;;  %s6105_s15 = sshll.u32 %s7537_s4, 4  ;;  %s6106_s15 = int_to_ptr.vmem [resolvable:$true] %s6105_s15 }
 0x871   :  { %7493 = vpow2.f32 %v6117_v37  ;;  %s7503_s1 = scalar_lea.vmem %s6106_s15, 256  ;;  %p7508_p1 = scmp.lt.s32.totalorder %s6106_s15, %s6106_s15 }
 0x872   :  { %7495 = vpow2.f32 %v6116_v39  ;;  %p7504_p0 = scmp.ne.s32.totalorder %s6106_s15, %s7503_s1  ;;  %p7509_p2 = scmp.lt.s32.totalorder %s7503_s1, %s7503_s1 }
 0x874   :  { %p7510_p3 = por %p7509_p2, %p7508_p1 }
 0x876   :  { %p7511_p4 = pnand %p7510_p3, %p7504_p0 }
 0x87b   :  { %v7494_v41 = vpop.eup %7493 }
 0x87c   :  { %v7496_v17 = vpop.eup %7495  ;;  %v5484_v23 = vadd.f32 1.0, %v7494_v41 }
 0x87d   :  { %v5483_v24 = vadd.f32 1.0, %v7496_v17 }
 0x87e   :  { %7497 = vrcp.f32 %v5484_v23 }
 0x87f   :  { %7499 = vrcp.f32 %v5483_v24 }
 0x888   :  { %v7498_v58 = vpop.eup %7497 }
 0x889   :  { %v7500_v30 = vpop.eup %7499  ;;  %v5490_v43 = vmul.f32 %v7498_v58, %v6807_v48  ;;  %v5628_v48 = vand.u32 4294901760, %v5627_v63 }
 0x88a   :  { %v5489_v47 = vmul.f32 %v7500_v30, %v5467_v3 }
 0x88b   :  { %v7230_v0 = vpack.c.bf16 %v5635_v2, %v5628_v48 }
 0x8e1   :  { %v5496_v11 = vpop.permute.xlu1 %5495 }
 0x8e2   :  { %v5500_v27 = vmul.f32 %v5496_v11, %v5490_v43  ;;  %v5494_v46 = vpop.permute.xlu0 %5493 }
 0x8e3   :  { %v5499_v50 = vmul.f32 %v5494_v46, %v5489_v47 }
 0x8e4   :  { %v5514_v51 = vsel %vm5509_vm3, %v5500_v27, 0 }
 0x8e5   :  { %v5599_v56 = vand.u32 4294901760, %v5514_v51  ;;  %v5511_v59 = vsel %vm5509_vm3, %v5499_v50, 0 }
 0x8e6   :  { %v5589_v40 = vand.u32 4294901760, %v5511_v59 }
 0x8e7   :  { %v5600_v52 = vsub.f32 %v5514_v51, %v5599_v56 }
 0x8e8   :  { %v5590_v22 = vsub.f32 %v5511_v59, %v5589_v40 }
 0x8e9   :  { %v5601_v61 = vand.u32 4294901760, %v5600_v52 }
 0x8ea   :  { %v5591_v62 = vand.u32 4294901760, %v5590_v22 }
 0x8eb   :  { %v5602_v44 = vsub.f32 %v5600_v52, %v5601_v61 }
 0x8ec   :  { %6881 = vmatprep.mubr.f32.mxu0 %v5591_v62  ;;  %v5592_v3 = vsub.f32 %v5590_v22, %v5591_v62 }
 0x8ed   :  { %6882 = vmatmul.mubr.f32.vlgmr.msra.gmra.mrb[10].mxu0 %v5601_v61  ;;  %v5603_v31 = vand.u32 4294901760, %v5602_v44 }
 0x8ee   :  { %7277 = vmatpush3.bf16.msra.mxu0 %v8151_v60  ;;  %6900 = vmatprep.mubr.f32.mxu0 %v5589_v40  ;;  %v5593_v5 = vand.u32 4294901760, %v5592_v3  ;;  %v7246_v60 = vpack.c.bf16 %v5632_v25, %v5625_v32 }
 0x8ef   :  { %7279 = vmatprep.subr.bf16.mxu0 %v7278_v34 }
 0x8f0   :  { %6824 = vmatprep.mubr.f32.mxu1 %v5593_v5 }
 0x8f1   :  { %6825 = vmatmul.mubr.f32.vlgmr.msra.gmra.mrb[6].mxu1 %v5603_v31 }
 0x8f2   :  { %7229 = vmatpush3.bf16.msra.mxu1 %v8156_v4  ;;  %7281 = vmatpush3.bf16.msra.mxu0 %v7278_v34 }
 0x8f3   :  { %6843 = vmatprep.mubr.f32.mxu1 %v5589_v40  ;;  %7231 = vmatprep.subr.bf16.mxu1 %v7230_v0 }
 0x8f4   :  { %7283 = vmatprep.subr.bf16.mxu0 %v8159_v10 }
 0x8f6   :  { %7233 = vmatpush3.bf16.msra.mxu1 %v7230_v0  ;;  %7285 = vmatpush3.bf16.msra.mxu0 %v8159_v10 }
 0x8f7   :  { %7235 = vmatprep.subr.bf16.mxu1 %v8163_v18  ;;  %7287 = vmatprep.subr.bf16.mxu0 %v8161_v14 }
 0x8fa   :  { %7237 = vmatpush3.bf16.msra.mxu1 %v8163_v18  ;;  %7289 = vmatpush3.bf16.msra.mxu0 %v8161_v14 }
 0x8fb   :  { %7239 = vmatprep.subr.bf16.mxu1 %v8165_v28  ;;  %7291 = vmatprep.subr.bf16.mxu0 %v8111_v21 }
 0x8fd   :  { %6901 = vmatmul.mubr.f32.vlgmr.msra.gmra.mrb[10].mxu0 %v5599_v56 }
 0x8fe   :  { %7241 = vmatpush3.bf16.msra.mxu1 %v8165_v28  ;;  %7293 = vmatpush3.bf16.msra.mxu0 %v8111_v21 }
 0x8ff   :  { %6919 = vmatprep.mubr.f32.mxu0 %v5589_v40  ;;  %7243 = vmatprep.subr.bf16.mxu1 %v8167_v33 }
 0x900   :  { %7295 = vmatprep.subr.bf16.mxu0 %v8117_v45 }
 0x901   :  { %6844 = vmatmul.mubr.f32.vlgmr.msra.gmra.mrb[6].mxu1 %v5599_v56 }
 0x902   :  { %7245 = vmatpush3.bf16.msra.mxu1 %v8167_v33  ;;  %6862 = vmatprep.mubr.f32.mxu1 %v5590_v22 }
 0x903   :  { %7297 = vmatpush3.bf16.msra.mxu0 %v8117_v45  ;;  %7247 = vmatprep.subr.bf16.mxu1 %v7246_v60 }
 0x904   :  { %7299 = vmatprep.subr.bf16.mxu0 %v8133_v49 }
 0x906   :  { %7249 = vmatpush3.bf16.msra.mxu1 %v7246_v60 }
 0x907   :  { %7301 = vmatpush3.bf16.msra.mxu0 %v8133_v49  ;;  %7251 = vmatprep.subr.bf16.mxu1 %v8169_v35 }
 0x908   :  { %7303 = vmatprep.subr.bf16.mxu0 %v8145_v54 }
 0x90a   :  { %7253 = vmatpush3.bf16.msra.mxu1 %v8169_v35 }
 0x90b   :  { %7305 = vmatpush3.bf16.msra.mxu0 %v8145_v54  ;;  %7255 = vmatprep.subr.bf16.mxu1 %v8171_v36 }
 0x90e   :  { %6920 = vmatmul.mubr.f32.vlgmr.msra.gmra.mrb[10].mxu0 %v5599_v56  ;;  %7257 = vmatpush3.bf16.msra.mxu1 %v8171_v36 }
 0x911   :  { %6863 = vmatmul.mubr.f32.vlgmr.msra.gmra.mrb[6].mxu1 %v5600_v52 }
 0x9e1   :  { %v6921_v21 = vpop.f32.mrb[10].mxu0 }
 0x9e2   :  { %v6086_v45 = vpop.f32.mrb[11].mxu0 }
 0x9e4   :  { %v6864_v4 = vpop.f32.mrb[6].mxu1 }
 0x9e5   :  { %v7314_v6 = vadd.f32 %v6921_v21, %v6864_v4  ;;  %v5810_v7 = vpop.f32.mrb[7].mxu1 }
 0x9e6   :  { %v7315_v49 = vadd.f32 %v6086_v45, %v5810_v7 }
 0x9e7   :  { %v6097_v8 = vadd.f32 %v7314_v6, %v8048_v53 }
 0x9e8   :  { %v6096_v9 = vadd.f32 %v7315_v49, %v8053_v42 }
 0x9e9   :  { %6099 = vst.msk [vmem:[#allocation2 + $0x8] sm:$0xff] %vm31_vm0, %v6097_v8 }
 0x9ea   :  { %6098 = vst.msk [vmem:[#allocation2] sm:$0xff] %vm31_vm0, %v6096_v9 }
 0x9eb   :  { %7514 = shalt.err (!%p7511_p4)
}
 0x9ec   :  { %s7515_s10 = scalar_lea.hbm %s8224_s5, 256 }
 0x9ed   :  { %p7516_p5 = scmp.ne.s32.totalorder %s8224_s5, %s7515_s10  ;;  %p7519_p6 = scmp.lt.u32.totalorder %s7515_s10, %s8224_s5 }
 0x9ef   :  { %p7521_p7 = pnand %p7519_p6, %p7516_p5 }
 0x9f1   :  { %7524 = shalt.err (!%p7521_p7)
}
 0x9f2   :  { %s7538_s13 = smov 128   ;;  %s7539_s14 = smov 8  }
 0x9f3   :  { %6111 = dma.vmem_to_hbm [thread:$0]  %s6106_s15, 256, %s8224_s5, [#allocation3], %s7538_s13, %s7538_s13, %s7539_s14  }
 0x9f4   :  { %7525 = dma.done.wait [#allocation3], 256  }
 0x9f5   :  { %7526 = vsyncadd [#allocation3], 4294967040 }
 0x9f6   :  { %6115 = vsyncpa [#allocation3], 1 }

</bundles_post_ra>
